<compile_context>
chip_gen: v7x
topology: tpu7x:2x2x1
jax: 0.10.0
libtpu: 0.0.40
codegen_flags: <defaults>
</compile_context>

<pallas_src>
import jax
import jax.numpy as jnp
from jax import lax
from jax.experimental import pallas as pl
from jax.experimental.pallas import tpu as pltpu


def _make_kernel(S, B, F, H):
    def kernel(x_ref, wih_ref, whh_ref, whead_ref, bhead_ref,
               out_ref, gx_ref, hall_ref):
        # 1) Input projection on the VPU (K=F is tiny; no MXU pass wasted).
        #    One vectorized FMA chain for all S*B rows -> (S*B, 4H) f32 scratch.
        gx = x_ref[:, 0:1] * wih_ref[0:1, :]
        for f in range(1, F):
            gx = gx + x_ref[:, f:f + 1] * wih_ref[f:f + 1, :]
        gx_ref[...] = gx

        # sigmoid(x) == 0.5 * tanh(0.5 x) + 0.5 : 1 EUP push instead of exp + reciprocal.
        def sigm(v):
            return 0.5 * jnp.tanh(0.5 * v) + 0.5

        # 2) init_hidden: zero hidden & cell state (kept in f32 vregs).
        h = jnp.zeros((B, H), jnp.float32)
        c = jnp.zeros((B, H), jnp.float32)

        # 3) Serial recurrence, fully unrolled (S is small & static).  Only the
        #    H-contraction h @ W_hh^T stays on the critical path; it is a single
        #    bf16 MXU pass with f32 accumulation.  Gate order: i, f, g, o.
        #    With H == 128 each gate slice is an aligned 128-lane tile.
        for t in range(S):
            gates = gx_ref[t * B:(t + 1) * B, :] + jnp.dot(
                h.astype(jnp.bfloat16), whh_ref[...],
                preferred_element_type=jnp.float32)              # (B, 4H) f32
            i_g = sigm(gates[:, 0 * H:1 * H])
            f_g = sigm(gates[:, 1 * H:2 * H])
            g_g = jnp.tanh(gates[:, 2 * H:3 * H])
            o_g = sigm(gates[:, 3 * H:4 * H])
            c = f_g * c + i_g * g_g
            h = o_g * jnp.tanh(c)
            hall_ref[t * B:(t + 1) * B, :] = h

        # 4) Fused note+duration head, outside the recurrence: one lane-dense
        #    bf16 x bf16 -> f32 matmul + bias over all S*B rows.
        out_ref[...] = (jnp.dot(hall_ref[...].astype(jnp.bfloat16), whead_ref[...],
                                preferred_element_type=jnp.float32)
                        + bhead_ref[...])

    return kernel


@jax.jit
def music_lstm_forward(x, params):
    """x: (seq, batch, features) float32.

    params (PyTorch layouts):
      w_ih  : (4H, F)   LSTM weight_ih_l0 (bias=False)
      w_hh  : (4H, H)   LSTM weight_hh_l0
      w_note: (P, H), b_note: (P,)   note_head Linear
      w_dur : (1, H), b_dur : (1,)   duration_head Linear

    Returns (note_logits, duration) with shapes (S*B, P) and (S*B, 1)
    (== PackedSequence.data for equal-length sequences).
    """
    S, B, F = x.shape
    H = params["w_hh"].shape[1]
    P = params["w_note"].shape[0]
    Pf = P + 1                              # note columns + fused duration column
    P_pad = ((Pf + 127) // 128) * 128       # lane-dense (multiple of 128) output width

    # Weight prep (compiles away under jit): transpose, fuse + zero-pad the heads,
    # cast the MXU operands to bf16 (halves weight DMA, single-pass MXU).
    w_ih_t = params["w_ih"].T.astype(jnp.float32)                  # (F, 4H) f32 (VPU path)
    w_hh_t = params["w_hh"].T.astype(jnp.bfloat16)                 # (H, 4H) bf16 (MXU RHS)
    w_head = jnp.concatenate(
        [params["w_note"], params["w_dur"]], axis=0).T             # (H, P+1)
    w_head = jnp.pad(w_head, ((0, 0), (0, P_pad - Pf))).astype(jnp.bfloat16)
    b_head = jnp.concatenate([params["b_note"], params["b_dur"]], axis=0)
    b_head = jnp.pad(b_head, (0, P_pad - Pf)).reshape(1, P_pad).astype(jnp.float32)

    x2d = x.reshape(S * B, F).astype(jnp.float32)                  # time-major packed rows

    vmem = pltpu.MemorySpace.VMEM
    out = pl.pallas_call(
        _make_kernel(S, B, F, H),
        out_shape=jax.ShapeDtypeStruct((S * B, P_pad), jnp.float32),
        in_specs=[pl.BlockSpec(memory_space=vmem)] * 5,
        out_specs=pl.BlockSpec(memory_space=vmem),
        scratch_shapes=[
            pltpu.VMEM((S * B, 4 * H), jnp.float32),   # gates_x (hoisted input projection)
            pltpu.VMEM((S * B, H), jnp.float32),       # all hidden states h_t
        ],
    )(x2d, w_ih_t, w_hh_t, w_head, b_head)

    note_logits = out[:, :P]          # (S*B, 129)
    duration = out[:, P:P + 1]        # (S*B, 1)
    return note_logits, duration


def _reference_forward(x, params):
    """Pure-JAX f32 reference (lax.scan LSTM + linear heads), explicit HIGHEST precision."""
    S, B, F = x.shape
    H = params["w_hh"].shape[1]
    hi = lax.Precision.HIGHEST
    w_ih_t = params["w_ih"].T
    w_hh_t = params["w_hh"].T

    def step(carry, x_t):
        h, c = carry
        gates = (jnp.dot(x_t, w_ih_t, precision=hi)
                 + jnp.dot(h, w_hh_t, precision=hi))
        i = jax.nn.sigmoid(gates[:, 0 * H:1 * H])
        f = jax.nn.sigmoid(gates[:, 1 * H:2 * H])
        g = jnp.tanh(gates[:, 2 * H:3 * H])
        o = jax.nn.sigmoid(gates[:, 3 * H:4 * H])
        c = f * c + i * g
        h = o * jnp.tanh(c)
        return (h, c), h

    h0 = jnp.zeros((B, H), jnp.float32)
    c0 = jnp.zeros((B, H), jnp.float32)
    _, hs = lax.scan(step, (h0, c0), x)                 # (S, B, H)
    flat = hs.reshape(S * B, H)
    note = jnp.dot(flat, params["w_note"].T, precision=hi) + params["b_note"]
    dur = jnp.dot(flat, params["w_dur"].T, precision=hi) + params["b_dur"]
    return note, dur


if __name__ == "__main__":
    # Small shapes consistent with the module defaults:
    # features=2, hidden=128, num_pitches=129; batch=8 (sublane aligned), seq=8.
    num_features = 2
    hidden_size = 128
    num_pitches = 129
    batch = 8
    seq = 8

    key = jax.random.PRNGKey(0)
    k = jax.random.split(key, 7)

    params = {
        "w_ih": jax.random.normal(k[0], (4 * hidden_size, num_features), jnp.float32) * 0.1,
        "w_hh": jax.random.normal(k[1], (4 * hidden_size, hidden_size), jnp.float32) * 0.1,
        "w_note": jax.random.normal(k[2], (num_pitches, hidden_size), jnp.float32) * 0.1,
        "b_note": jax.random.normal(k[3], (num_pitches,), jnp.float32) * 0.1,
        "w_dur": jax.random.normal(k[4], (1, hidden_size), jnp.float32) * 0.1,
        "b_dur": jax.random.normal(k[5], (1,), jnp.float32) * 0.1,
    }

    # Time-major input (equivalent to PackedSequence.data with equal lengths).
    x = jax.random.normal(k[6], (seq, batch, num_features), jnp.float32)

    note_logits, duration_pred = music_lstm_forward(x, params)
    note_logits = jax.block_until_ready(note_logits)
    duration_pred = jax.block_until_ready(duration_pred)

    ref_note, ref_dur = _reference_forward(x, params)

    assert note_logits.shape == (seq * batch, num_pitches)
    assert duration_pred.shape == (seq * batch, 1)
    # Tolerance loosened vs. the f32 reference: kernel uses bf16 weights / bf16 MXU
    # operands with f32 accumulation (per perf review).
    assert jnp.allclose(note_logits, ref_note, atol=5e-2, rtol=5e-2), \
        float(jnp.max(jnp.abs(note_logits - ref_note)))
    assert jnp.allclose(duration_pred, ref_dur, atol=5e-2, rtol=5e-2), \
        float(jnp.max(jnp.abs(duration_pred - ref_dur)))

    print("KERNEL_OK")
</pallas_src>

<mosaic_0001>
module attributes {stable_mosaic.version = 11 : i64} {
  func.func @kernel(%arg0: memref<64x2xf32, #tpu.memory_space<vmem>>, %arg1: memref<2x512xf32, #tpu.memory_space<vmem>>, %arg2: memref<128x512xbf16, #tpu.memory_space<vmem>>, %arg3: memref<128x256xbf16, #tpu.memory_space<vmem>>, %arg4: memref<1x256xf32, #tpu.memory_space<vmem>>, %arg5: memref<64x256xf32, #tpu.memory_space<vmem>>, %arg6: memref<64x512xf32, #tpu.memory_space<vmem>>, %arg7: memref<64x128xf32, #tpu.memory_space<vmem>>) attributes {dimension_semantics = [], scalar_prefetch = 0 : i64, scratch_operands = 2 : i64, tpu.core_type = #tpu.core_type<tc>} {
    %c0 = arith.constant 0 : index
    %c0_0 = arith.constant 0 : index
    %0 = vector.load %arg0[%c0, %c0_0] : memref<64x2xf32, #tpu.memory_space<vmem>>, vector<64x1xf32>
    %c0_1 = arith.constant 0 : index
    %c0_2 = arith.constant 0 : index
    %1 = vector.load %arg1[%c0_1, %c0_2] : memref<2x512xf32, #tpu.memory_space<vmem>>, vector<1x512xf32>
    %2 = vector.broadcast %0 : vector<64x1xf32> to vector<64x512xf32>
    %3 = vector.broadcast %1 : vector<1x512xf32> to vector<64x512xf32>
    %4 = arith.mulf %2, %3 : vector<64x512xf32>
    %c0_3 = arith.constant 0 : index
    %c1 = arith.constant 1 : index
    %5 = vector.load %arg0[%c0_3, %c1] : memref<64x2xf32, #tpu.memory_space<vmem>>, vector<64x1xf32>
    %c1_4 = arith.constant 1 : index
    %c0_5 = arith.constant 0 : index
    %6 = vector.load %arg1[%c1_4, %c0_5] : memref<2x512xf32, #tpu.memory_space<vmem>>, vector<1x512xf32>
    %7 = vector.broadcast %5 : vector<64x1xf32> to vector<64x512xf32>
    %8 = vector.broadcast %6 : vector<1x512xf32> to vector<64x512xf32>
    %9 = arith.mulf %7, %8 : vector<64x512xf32>
    %10 = arith.addf %4, %9 : vector<64x512xf32>
    %c0_6 = arith.constant 0 : index
    %c0_7 = arith.constant 0 : index
    %11 = vector.load %arg6[%c0_6, %c0_7] : memref<64x512xf32, #tpu.memory_space<vmem>>, vector<64x512xf32>
    tpu.vector_store %arg6[%c0_6, %c0_7], %10 {strides = array<i32>} : memref<64x512xf32, #tpu.memory_space<vmem>>, vector<64x512xf32>,
    %cst = arith.constant 0.000000e+00 : f32
    %12 = vector.broadcast %cst : f32 to vector<8x128xf32>
    %cst_8 = arith.constant 0.000000e+00 : f32
    %13 = vector.broadcast %cst_8 : f32 to vector<8x128xf32>
    %c0_9 = arith.constant 0 : index
    %c0_10 = arith.constant 0 : index
    %14 = vector.load %arg6[%c0_9, %c0_10] : memref<64x512xf32, #tpu.memory_space<vmem>>, vector<8x512xf32>
    %15 = arith.truncf %12 : vector<8x128xf32> to vector<8x128xbf16>
    %c0_11 = arith.constant 0 : index
    %c0_12 = arith.constant 0 : index
    %16 = vector.load %arg2[%c0_11, %c0_12] : memref<128x512xbf16, #tpu.memory_space<vmem>>, vector<128x512xbf16>
    %cst_13 = arith.constant dense<0.000000e+00> : vector<8x512xf32>
    %17 = tpu.matmul %15, %16, %cst_13 {dimension_numbers = #tpu.dot_dimension_numbers<[1], [0], [0], [1], [0, 0, 1, 1], [], []>} : vector<8x128xbf16>, vector<128x512xbf16>, vector<8x512xf32> -> vector<8x512xf32>
    %18 = arith.addf %14, %17 : vector<8x512xf32>
    %19 = vector.extract_strided_slice %18 {offsets = [0, 0], sizes = [8, 128], strides = [1, 1]} : vector<8x512xf32> to vector<8x128xf32>
    %cst_14 = arith.constant 5.000000e-01 : f32
    %20 = vector.broadcast %cst_14 : f32 to vector<8x128xf32>
    %21 = arith.mulf %20, %19 : vector<8x128xf32>
    %22 = math.tanh %21 : vector<8x128xf32>
    %cst_15 = arith.constant 5.000000e-01 : f32
    %23 = vector.broadcast %cst_15 : f32 to vector<8x128xf32>
    %24 = arith.mulf %23, %22 : vector<8x128xf32>
    %cst_16 = arith.constant 5.000000e-01 : f32
    %25 = vector.broadcast %cst_16 : f32 to vector<8x128xf32>
    %26 = arith.addf %24, %25 : vector<8x128xf32>
    %27 = vector.extract_strided_slice %18 {offsets = [0, 128], sizes = [8, 128], strides = [1, 1]} : vector<8x512xf32> to vector<8x128xf32>
    %cst_17 = arith.constant 5.000000e-01 : f32
    %28 = vector.broadcast %cst_17 : f32 to vector<8x128xf32>
    %29 = arith.mulf %28, %27 : vector<8x128xf32>
    %30 = math.tanh %29 : vector<8x128xf32>
    %cst_18 = arith.constant 5.000000e-01 : f32
    %31 = vector.broadcast %cst_18 : f32 to vector<8x128xf32>
    %32 = arith.mulf %31, %30 : vector<8x128xf32>
    %cst_19 = arith.constant 5.000000e-01 : f32
    %33 = vector.broadcast %cst_19 : f32 to vector<8x128xf32>
    %34 = arith.addf %32, %33 : vector<8x128xf32>
    %35 = vector.extract_strided_slice %18 {offsets = [0, 256], sizes = [8, 128], strides = [1, 1]} : vector<8x512xf32> to vector<8x128xf32>
    %36 = math.tanh %35 : vector<8x128xf32>
    %37 = vector.extract_strided_slice %18 {offsets = [0, 384], sizes = [8, 128], strides = [1, 1]} : vector<8x512xf32> to vector<8x128xf32>
    %cst_20 = arith.constant 5.000000e-01 : f32
    %38 = vector.broadcast %cst_20 : f32 to vector<8x128xf32>
    %39 = arith.mulf %38, %37 : vector<8x128xf32>
    %40 = math.tanh %39 : vector<8x128xf32>
    %cst_21 = arith.constant 5.000000e-01 : f32
    %41 = vector.broadcast %cst_21 : f32 to vector<8x128xf32>
    %42 = arith.mulf %41, %40 : vector<8x128xf32>
    %cst_22 = arith.constant 5.000000e-01 : f32
    %43 = vector.broadcast %cst_22 : f32 to vector<8x128xf32>
    %44 = arith.addf %42, %43 : vector<8x128xf32>
    %45 = arith.mulf %34, %13 : vector<8x128xf32>
    %46 = arith.mulf %26, %36 : vector<8x128xf32>
    %47 = arith.addf %45, %46 : vector<8x128xf32>
    %48 = math.tanh %47 : vector<8x128xf32>
    %49 = arith.mulf %44, %48 : vector<8x128xf32>
    %c0_23 = arith.constant 0 : index
    %c0_24 = arith.constant 0 : index
    %50 = vector.load %arg7[%c0_23, %c0_24] : memref<64x128xf32, #tpu.memory_space<vmem>>, vector<8x128xf32>
    tpu.vector_store %arg7[%c0_23, %c0_24], %49 {strides = array<i32>} : memref<64x128xf32, #tpu.memory_space<vmem>>, vector<8x128xf32>,
    %c8 = arith.constant 8 : index
    %c0_25 = arith.constant 0 : index
    %51 = vector.load %arg6[%c8, %c0_25] : memref<64x512xf32, #tpu.memory_space<vmem>>, vector<8x512xf32>
    %52 = arith.truncf %49 : vector<8x128xf32> to vector<8x128xbf16>
    %c0_26 = arith.constant 0 : index
    %c0_27 = arith.constant 0 : index
    %53 = vector.load %arg2[%c0_26, %c0_27] : memref<128x512xbf16, #tpu.memory_space<vmem>>, vector<128x512xbf16>
    %cst_28 = arith.constant dense<0.000000e+00> : vector<8x512xf32>
    %54 = tpu.matmul %52, %53, %cst_28 {dimension_numbers = #tpu.dot_dimension_numbers<[1], [0], [0], [1], [0, 0, 1, 1], [], []>} : vector<8x128xbf16>, vector<128x512xbf16>, vector<8x512xf32> -> vector<8x512xf32>
    %55 = arith.addf %51, %54 : vector<8x512xf32>
    %56 = vector.extract_strided_slice %55 {offsets = [0, 0], sizes = [8, 128], strides = [1, 1]} : vector<8x512xf32> to vector<8x128xf32>
    %cst_29 = arith.constant 5.000000e-01 : f32
    %57 = vector.broadcast %cst_29 : f32 to vector<8x128xf32>
    %58 = arith.mulf %57, %56 : vector<8x128xf32>
    %59 = math.tanh %58 : vector<8x128xf32>
    %cst_30 = arith.constant 5.000000e-01 : f32
    %60 = vector.broadcast %cst_30 : f32 to vector<8x128xf32>
    %61 = arith.mulf %60, %59 : vector<8x128xf32>
    %cst_31 = arith.constant 5.000000e-01 : f32
    %62 = vector.broadcast %cst_31 : f32 to vector<8x128xf32>
    %63 = arith.addf %61, %62 : vector<8x128xf32>
    %64 = vector.extract_strided_slice %55 {offsets = [0, 128], sizes = [8, 128], strides = [1, 1]} : vector<8x512xf32> to vector<8x128xf32>
    %cst_32 = arith.constant 5.000000e-01 : f32
    %65 = vector.broadcast %cst_32 : f32 to vector<8x128xf32>
    %66 = arith.mulf %65, %64 : vector<8x128xf32>
    %67 = math.tanh %66 : vector<8x128xf32>
    %cst_33 = arith.constant 5.000000e-01 : f32
    %68 = vector.broadcast %cst_33 : f32 to vector<8x128xf32>
    %69 = arith.mulf %68, %67 : vector<8x128xf32>
    %cst_34 = arith.constant 5.000000e-01 : f32
    %70 = vector.broadcast %cst_34 : f32 to vector<8x128xf32>
    %71 = arith.addf %69, %70 : vector<8x128xf32>
    %72 = vector.extract_strided_slice %55 {offsets = [0, 256], sizes = [8, 128], strides = [1, 1]} : vector<8x512xf32> to vector<8x128xf32>
    %73 = math.tanh %72 : vector<8x128xf32>
    %74 = vector.extract_strided_slice %55 {offsets = [0, 384], sizes = [8, 128], strides = [1, 1]} : vector<8x512xf32> to vector<8x128xf32>
    %cst_35 = arith.constant 5.000000e-01 : f32
    %75 = vector.broadcast %cst_35 : f32 to vector<8x128xf32>
    %76 = arith.mulf %75, %74 : vector<8x128xf32>
    %77 = math.tanh %76 : vector<8x128xf32>
    %cst_36 = arith.constant 5.000000e-01 : f32
    %78 = vector.broadcast %cst_36 : f32 to vector<8x128xf32>
    %79 = arith.mulf %78, %77 : vector<8x128xf32>
    %cst_37 = arith.constant 5.000000e-01 : f32
    %80 = vector.broadcast %cst_37 : f32 to vector<8x128xf32>
    %81 = arith.addf %79, %80 : vector<8x128xf32>
    %82 = arith.mulf %71, %47 : vector<8x128xf32>
    %83 = arith.mulf %63, %73 : vector<8x128xf32>
    %84 = arith.addf %82, %83 : vector<8x128xf32>
    %85 = math.tanh %84 : vector<8x128xf32>
    %86 = arith.mulf %81, %85 : vector<8x128xf32>
    %c8_38 = arith.constant 8 : index
    %c0_39 = arith.constant 0 : index
    %87 = vector.load %arg7[%c8_38, %c0_39] : memref<64x128xf32, #tpu.memory_space<vmem>>, vector<8x128xf32>
    tpu.vector_store %arg7[%c8_38, %c0_39], %86 {strides = array<i32>} : memref<64x128xf32, #tpu.memory_space<vmem>>, vector<8x128xf32>,
    %c16 = arith.constant 16 : index
    %c0_40 = arith.constant 0 : index
    %88 = vector.load %arg6[%c16, %c0_40] : memref<64x512xf32, #tpu.memory_space<vmem>>, vector<8x512xf32>
    %89 = arith.truncf %86 : vector<8x128xf32> to vector<8x128xbf16>
    %c0_41 = arith.constant 0 : index
    %c0_42 = arith.constant 0 : index
    %90 = vector.load %arg2[%c0_41, %c0_42] : memref<128x512xbf16, #tpu.memory_space<vmem>>, vector<128x512xbf16>
    %cst_43 = arith.constant dense<0.000000e+00> : vector<8x512xf32>
    %91 = tpu.matmul %89, %90, %cst_43 {dimension_numbers = #tpu.dot_dimension_numbers<[1], [0], [0], [1], [0, 0, 1, 1], [], []>} : vector<8x128xbf16>, vector<128x512xbf16>, vector<8x512xf32> -> vector<8x512xf32>
    %92 = arith.addf %88, %91 : vector<8x512xf32>
    %93 = vector.extract_strided_slice %92 {offsets = [0, 0], sizes = [8, 128], strides = [1, 1]} : vector<8x512xf32> to vector<8x128xf32>
    %cst_44 = arith.constant 5.000000e-01 : f32
    %94 = vector.broadcast %cst_44 : f32 to vector<8x128xf32>
    %95 = arith.mulf %94, %93 : vector<8x128xf32>
    %96 = math.tanh %95 : vector<8x128xf32>
    %cst_45 = arith.constant 5.000000e-01 : f32
    %97 = vector.broadcast %cst_45 : f32 to vector<8x128xf32>
    %98 = arith.mulf %97, %96 : vector<8x128xf32>
    %cst_46 = arith.constant 5.000000e-01 : f32
    %99 = vector.broadcast %cst_46 : f32 to vector<8x128xf32>
    %100 = arith.addf %98, %99 : vector<8x128xf32>
    %101 = vector.extract_strided_slice %92 {offsets = [0, 128], sizes = [8, 128], strides = [1, 1]} : vector<8x512xf32> to vector<8x128xf32>
    %cst_47 = arith.constant 5.000000e-01 : f32
    %102 = vector.broadcast %cst_47 : f32 to vector<8x128xf32>
    %103 = arith.mulf %102, %101 : vector<8x128xf32>
    %104 = math.tanh %103 : vector<8x128xf32>
    %cst_48 = arith.constant 5.000000e-01 : f32
    %105 = vector.broadcast %cst_48 : f32 to vector<8x128xf32>
    %106 = arith.mulf %105, %104 : vector<8x128xf32>
    %cst_49 = arith.constant 5.000000e-01 : f32
    %107 = vector.broadcast %cst_49 : f32 to vector<8x128xf32>
    %108 = arith.addf %106, %107 : vector<8x128xf32>
    %109 = vector.extract_strided_slice %92 {offsets = [0, 256], sizes = [8, 128], strides = [1, 1]} : vector<8x512xf32> to vector<8x128xf32>
    %110 = math.tanh %109 : vector<8x128xf32>
    %111 = vector.extract_strided_slice %92 {offsets = [0, 384], sizes = [8, 128], strides = [1, 1]} : vector<8x512xf32> to vector<8x128xf32>
    %cst_50 = arith.constant 5.000000e-01 : f32
    %112 = vector.broadcast %cst_50 : f32 to vector<8x128xf32>
    %113 = arith.mulf %112, %111 : vector<8x128xf32>
    %114 = math.tanh %113 : vector<8x128xf32>
    %cst_51 = arith.constant 5.000000e-01 : f32
    %115 = vector.broadcast %cst_51 : f32 to vector<8x128xf32>
    %116 = arith.mulf %115, %114 : vector<8x128xf32>
    %cst_52 = arith.constant 5.000000e-01 : f32
    %117 = vector.broadcast %cst_52 : f32 to vector<8x128xf32>
    %118 = arith.addf %116, %117 : vector<8x128xf32>
    %119 = arith.mulf %108, %84 : vector<8x128xf32>
    %120 = arith.mulf %100, %110 : vector<8x128xf32>
    %121 = arith.addf %119, %120 : vector<8x128xf32>
    %122 = math.tanh %121 : vector<8x128xf32>
    %123 = arith.mulf %118, %122 : vector<8x128xf32>
    %c16_53 = arith.constant 16 : index
    %c0_54 = arith.constant 0 : index
    %124 = vector.load %arg7[%c16_53, %c0_54] : memref<64x128xf32, #tpu.memory_space<vmem>>, vector<8x128xf32>
    tpu.vector_store %arg7[%c16_53, %c0_54], %123 {strides = array<i32>} : memref<64x128xf32, #tpu.memory_space<vmem>>, vector<8x128xf32>,
    %c24 = arith.constant 24 : index
    %c0_55 = arith.constant 0 : index
    %125 = vector.load %arg6[%c24, %c0_55] : memref<64x512xf32, #tpu.memory_space<vmem>>, vector<8x512xf32>
    %126 = arith.truncf %123 : vector<8x128xf32> to vector<8x128xbf16>
    %c0_56 = arith.constant 0 : index
    %c0_57 = arith.constant 0 : index
    %127 = vector.load %arg2[%c0_56, %c0_57] : memref<128x512xbf16, #tpu.memory_space<vmem>>, vector<128x512xbf16>
    %cst_58 = arith.constant dense<0.000000e+00> : vector<8x512xf32>
    %128 = tpu.matmul %126, %127, %cst_58 {dimension_numbers = #tpu.dot_dimension_numbers<[1], [0], [0], [1], [0, 0, 1, 1], [], []>} : vector<8x128xbf16>, vector<128x512xbf16>, vector<8x512xf32> -> vector<8x512xf32>
    %129 = arith.addf %125, %128 : vector<8x512xf32>
    %130 = vector.extract_strided_slice %129 {offsets = [0, 0], sizes = [8, 128], strides = [1, 1]} : vector<8x512xf32> to vector<8x128xf32>
    %cst_59 = arith.constant 5.000000e-01 : f32
    %131 = vector.broadcast %cst_59 : f32 to vector<8x128xf32>
    %132 = arith.mulf %131, %130 : vector<8x128xf32>
    %133 = math.tanh %132 : vector<8x128xf32>
    %cst_60 = arith.constant 5.000000e-01 : f32
    %134 = vector.broadcast %cst_60 : f32 to vector<8x128xf32>
    %135 = arith.mulf %134, %133 : vector<8x128xf32>
    %cst_61 = arith.constant 5.000000e-01 : f32
    %136 = vector.broadcast %cst_61 : f32 to vector<8x128xf32>
    %137 = arith.addf %135, %136 : vector<8x128xf32>
    %138 = vector.extract_strided_slice %129 {offsets = [0, 128], sizes = [8, 128], strides = [1, 1]} : vector<8x512xf32> to vector<8x128xf32>
    %cst_62 = arith.constant 5.000000e-01 : f32
    %139 = vector.broadcast %cst_62 : f32 to vector<8x128xf32>
    %140 = arith.mulf %139, %138 : vector<8x128xf32>
    %141 = math.tanh %140 : vector<8x128xf32>
    %cst_63 = arith.constant 5.000000e-01 : f32
    %142 = vector.broadcast %cst_63 : f32 to vector<8x128xf32>
    %143 = arith.mulf %142, %141 : vector<8x128xf32>
    %cst_64 = arith.constant 5.000000e-01 : f32
    %144 = vector.broadcast %cst_64 : f32 to vector<8x128xf32>
    %145 = arith.addf %143, %144 : vector<8x128xf32>
    %146 = vector.extract_strided_slice %129 {offsets = [0, 256], sizes = [8, 128], strides = [1, 1]} : vector<8x512xf32> to vector<8x128xf32>
    %147 = math.tanh %146 : vector<8x128xf32>
    %148 = vector.extract_strided_slice %129 {offsets = [0, 384], sizes = [8, 128], strides = [1, 1]} : vector<8x512xf32> to vector<8x128xf32>
    %cst_65 = arith.constant 5.000000e-01 : f32
    %149 = vector.broadcast %cst_65 : f32 to vector<8x128xf32>
    %150 = arith.mulf %149, %148 : vector<8x128xf32>
    %151 = math.tanh %150 : vector<8x128xf32>
    %cst_66 = arith.constant 5.000000e-01 : f32
    %152 = vector.broadcast %cst_66 : f32 to vector<8x128xf32>
    %153 = arith.mulf %152, %151 : vector<8x128xf32>
    %cst_67 = arith.constant 5.000000e-01 : f32
    %154 = vector.broadcast %cst_67 : f32 to vector<8x128xf32>
    %155 = arith.addf %153, %154 : vector<8x128xf32>
    %156 = arith.mulf %145, %121 : vector<8x128xf32>
    %157 = arith.mulf %137, %147 : vector<8x128xf32>
    %158 = arith.addf %156, %157 : vector<8x128xf32>
    %159 = math.tanh %158 : vector<8x128xf32>
    %160 = arith.mulf %155, %159 : vector<8x128xf32>
    %c24_68 = arith.constant 24 : index
    %c0_69 = arith.constant 0 : index
    %161 = vector.load %arg7[%c24_68, %c0_69] : memref<64x128xf32, #tpu.memory_space<vmem>>, vector<8x128xf32>
    tpu.vector_store %arg7[%c24_68, %c0_69], %160 {strides = array<i32>} : memref<64x128xf32, #tpu.memory_space<vmem>>, vector<8x128xf32>,
    %c32 = arith.constant 32 : index
    %c0_70 = arith.constant 0 : index
    %162 = vector.load %arg6[%c32, %c0_70] : memref<64x512xf32, #tpu.memory_space<vmem>>, vector<8x512xf32>
    %163 = arith.truncf %160 : vector<8x128xf32> to vector<8x128xbf16>
    %c0_71 = arith.constant 0 : index
    %c0_72 = arith.constant 0 : index
    %164 = vector.load %arg2[%c0_71, %c0_72] : memref<128x512xbf16, #tpu.memory_space<vmem>>, vector<128x512xbf16>
    %cst_73 = arith.constant dense<0.000000e+00> : vector<8x512xf32>
    %165 = tpu.matmul %163, %164, %cst_73 {dimension_numbers = #tpu.dot_dimension_numbers<[1], [0], [0], [1], [0, 0, 1, 1], [], []>} : vector<8x128xbf16>, vector<128x512xbf16>, vector<8x512xf32> -> vector<8x512xf32>
    %166 = arith.addf %162, %165 : vector<8x512xf32>
    %167 = vector.extract_strided_slice %166 {offsets = [0, 0], sizes = [8, 128], strides = [1, 1]} : vector<8x512xf32> to vector<8x128xf32>
    %cst_74 = arith.constant 5.000000e-01 : f32
    %168 = vector.broadcast %cst_74 : f32 to vector<8x128xf32>
    %169 = arith.mulf %168, %167 : vector<8x128xf32>
    %170 = math.tanh %169 : vector<8x128xf32>
    %cst_75 = arith.constant 5.000000e-01 : f32
    %171 = vector.broadcast %cst_75 : f32 to vector<8x128xf32>
    %172 = arith.mulf %171, %170 : vector<8x128xf32>
    %cst_76 = arith.constant 5.000000e-01 : f32
    %173 = vector.broadcast %cst_76 : f32 to vector<8x128xf32>
    %174 = arith.addf %172, %173 : vector<8x128xf32>
    %175 = vector.extract_strided_slice %166 {offsets = [0, 128], sizes = [8, 128], strides = [1, 1]} : vector<8x512xf32> to vector<8x128xf32>
    %cst_77 = arith.constant 5.000000e-01 : f32
    %176 = vector.broadcast %cst_77 : f32 to vector<8x128xf32>
    %177 = arith.mulf %176, %175 : vector<8x128xf32>
    %178 = math.tanh %177 : vector<8x128xf32>
    %cst_78 = arith.constant 5.000000e-01 : f32
    %179 = vector.broadcast %cst_78 : f32 to vector<8x128xf32>
    %180 = arith.mulf %179, %178 : vector<8x128xf32>
    %cst_79 = arith.constant 5.000000e-01 : f32
    %181 = vector.broadcast %cst_79 : f32 to vector<8x128xf32>
    %182 = arith.addf %180, %181 : vector<8x128xf32>
    %183 = vector.extract_strided_slice %166 {offsets = [0, 256], sizes = [8, 128], strides = [1, 1]} : vector<8x512xf32> to vector<8x128xf32>
    %184 = math.tanh %183 : vector<8x128xf32>
    %185 = vector.extract_strided_slice %166 {offsets = [0, 384], sizes = [8, 128], strides = [1, 1]} : vector<8x512xf32> to vector<8x128xf32>
    %cst_80 = arith.constant 5.000000e-01 : f32
    %186 = vector.broadcast %cst_80 : f32 to vector<8x128xf32>
    %187 = arith.mulf %186, %185 : vector<8x128xf32>
    %188 = math.tanh %187 : vector<8x128xf32>
    %cst_81 = arith.constant 5.000000e-01 : f32
    %189 = vector.broadcast %cst_81 : f32 to vector<8x128xf32>
    %190 = arith.mulf %189, %188 : vector<8x128xf32>
    %cst_82 = arith.constant 5.000000e-01 : f32
    %191 = vector.broadcast %cst_82 : f32 to vector<8x128xf32>
    %192 = arith.addf %190, %191 : vector<8x128xf32>
    %193 = arith.mulf %182, %158 : vector<8x128xf32>
    %194 = arith.mulf %174, %184 : vector<8x128xf32>
    %195 = arith.addf %193, %194 : vector<8x128xf32>
    %196 = math.tanh %195 : vector<8x128xf32>
    %197 = arith.mulf %192, %196 : vector<8x128xf32>
    %c32_83 = arith.constant 32 : index
    %c0_84 = arith.constant 0 : index
    %198 = vector.load %arg7[%c32_83, %c0_84] : memref<64x128xf32, #tpu.memory_space<vmem>>, vector<8x128xf32>
    tpu.vector_store %arg7[%c32_83, %c0_84], %197 {strides = array<i32>} : memref<64x128xf32, #tpu.memory_space<vmem>>, vector<8x128xf32>,
    %c40 = arith.constant 40 : index
    %c0_85 = arith.constant 0 : index
    %199 = vector.load %arg6[%c40, %c0_85] : memref<64x512xf32, #tpu.memory_space<vmem>>, vector<8x512xf32>
    %200 = arith.truncf %197 : vector<8x128xf32> to vector<8x128xbf16>
    %c0_86 = arith.constant 0 : index
    %c0_87 = arith.constant 0 : index
    %201 = vector.load %arg2[%c0_86, %c0_87] : memref<128x512xbf16, #tpu.memory_space<vmem>>, vector<128x512xbf16>
    %cst_88 = arith.constant dense<0.000000e+00> : vector<8x512xf32>
    %202 = tpu.matmul %200, %201, %cst_88 {dimension_numbers = #tpu.dot_dimension_numbers<[1], [0], [0], [1], [0, 0, 1, 1], [], []>} : vector<8x128xbf16>, vector<128x512xbf16>, vector<8x512xf32> -> vector<8x512xf32>
    %203 = arith.addf %199, %202 : vector<8x512xf32>
    %204 = vector.extract_strided_slice %203 {offsets = [0, 0], sizes = [8, 128], strides = [1, 1]} : vector<8x512xf32> to vector<8x128xf32>
    %cst_89 = arith.constant 5.000000e-01 : f32
    %205 = vector.broadcast %cst_89 : f32 to vector<8x128xf32>
    %206 = arith.mulf %205, %204 : vector<8x128xf32>
    %207 = math.tanh %206 : vector<8x128xf32>
    %cst_90 = arith.constant 5.000000e-01 : f32
    %208 = vector.broadcast %cst_90 : f32 to vector<8x128xf32>
    %209 = arith.mulf %208, %207 : vector<8x128xf32>
    %cst_91 = arith.constant 5.000000e-01 : f32
    %210 = vector.broadcast %cst_91 : f32 to vector<8x128xf32>
    %211 = arith.addf %209, %210 : vector<8x128xf32>
    %212 = vector.extract_strided_slice %203 {offsets = [0, 128], sizes = [8, 128], strides = [1, 1]} : vector<8x512xf32> to vector<8x128xf32>
    %cst_92 = arith.constant 5.000000e-01 : f32
    %213 = vector.broadcast %cst_92 : f32 to vector<8x128xf32>
    %214 = arith.mulf %213, %212 : vector<8x128xf32>
    %215 = math.tanh %214 : vector<8x128xf32>
    %cst_93 = arith.constant 5.000000e-01 : f32
    %216 = vector.broadcast %cst_93 : f32 to vector<8x128xf32>
    %217 = arith.mulf %216, %215 : vector<8x128xf32>
    %cst_94 = arith.constant 5.000000e-01 : f32
    %218 = vector.broadcast %cst_94 : f32 to vector<8x128xf32>
    %219 = arith.addf %217, %218 : vector<8x128xf32>
    %220 = vector.extract_strided_slice %203 {offsets = [0, 256], sizes = [8, 128], strides = [1, 1]} : vector<8x512xf32> to vector<8x128xf32>
    %221 = math.tanh %220 : vector<8x128xf32>
    %222 = vector.extract_strided_slice %203 {offsets = [0, 384], sizes = [8, 128], strides = [1, 1]} : vector<8x512xf32> to vector<8x128xf32>
    %cst_95 = arith.constant 5.000000e-01 : f32
    %223 = vector.broadcast %cst_95 : f32 to vector<8x128xf32>
    %224 = arith.mulf %223, %222 : vector<8x128xf32>
    %225 = math.tanh %224 : vector<8x128xf32>
    %cst_96 = arith.constant 5.000000e-01 : f32
    %226 = vector.broadcast %cst_96 : f32 to vector<8x128xf32>
    %227 = arith.mulf %226, %225 : vector<8x128xf32>
    %cst_97 = arith.constant 5.000000e-01 : f32
    %228 = vector.broadcast %cst_97 : f32 to vector<8x128xf32>
    %229 = arith.addf %227, %228 : vector<8x128xf32>
    %230 = arith.mulf %219, %195 : vector<8x128xf32>
    %231 = arith.mulf %211, %221 : vector<8x128xf32>
    %232 = arith.addf %230, %231 : vector<8x128xf32>
    %233 = math.tanh %232 : vector<8x128xf32>
    %234 = arith.mulf %229, %233 : vector<8x128xf32>
    %c40_98 = arith.constant 40 : index
    %c0_99 = arith.constant 0 : index
    %235 = vector.load %arg7[%c40_98, %c0_99] : memref<64x128xf32, #tpu.memory_space<vmem>>, vector<8x128xf32>
    tpu.vector_store %arg7[%c40_98, %c0_99], %234 {strides = array<i32>} : memref<64x128xf32, #tpu.memory_space<vmem>>, vector<8x128xf32>,
    %c48 = arith.constant 48 : index
    %c0_100 = arith.constant 0 : index
    %236 = vector.load %arg6[%c48, %c0_100] : memref<64x512xf32, #tpu.memory_space<vmem>>, vector<8x512xf32>
    %237 = arith.truncf %234 : vector<8x128xf32> to vector<8x128xbf16>
    %c0_101 = arith.constant 0 : index
    %c0_102 = arith.constant 0 : index
    %238 = vector.load %arg2[%c0_101, %c0_102] : memref<128x512xbf16, #tpu.memory_space<vmem>>, vector<128x512xbf16>
    %cst_103 = arith.constant dense<0.000000e+00> : vector<8x512xf32>
    %239 = tpu.matmul %237, %238, %cst_103 {dimension_numbers = #tpu.dot_dimension_numbers<[1], [0], [0], [1], [0, 0, 1, 1], [], []>} : vector<8x128xbf16>, vector<128x512xbf16>, vector<8x512xf32> -> vector<8x512xf32>
    %240 = arith.addf %236, %239 : vector<8x512xf32>
    %241 = vector.extract_strided_slice %240 {offsets = [0, 0], sizes = [8, 128], strides = [1, 1]} : vector<8x512xf32> to vector<8x128xf32>
    %cst_104 = arith.constant 5.000000e-01 : f32
    %242 = vector.broadcast %cst_104 : f32 to vector<8x128xf32>
    %243 = arith.mulf %242, %241 : vector<8x128xf32>
    %244 = math.tanh %243 : vector<8x128xf32>
    %cst_105 = arith.constant 5.000000e-01 : f32
    %245 = vector.broadcast %cst_105 : f32 to vector<8x128xf32>
    %246 = arith.mulf %245, %244 : vector<8x128xf32>
    %cst_106 = arith.constant 5.000000e-01 : f32
    %247 = vector.broadcast %cst_106 : f32 to vector<8x128xf32>
    %248 = arith.addf %246, %247 : vector<8x128xf32>
    %249 = vector.extract_strided_slice %240 {offsets = [0, 128], sizes = [8, 128], strides = [1, 1]} : vector<8x512xf32> to vector<8x128xf32>
    %cst_107 = arith.constant 5.000000e-01 : f32
    %250 = vector.broadcast %cst_107 : f32 to vector<8x128xf32>
    %251 = arith.mulf %250, %249 : vector<8x128xf32>
    %252 = math.tanh %251 : vector<8x128xf32>
    %cst_108 = arith.constant 5.000000e-01 : f32
    %253 = vector.broadcast %cst_108 : f32 to vector<8x128xf32>
    %254 = arith.mulf %253, %252 : vector<8x128xf32>
    %cst_109 = arith.constant 5.000000e-01 : f32
    %255 = vector.broadcast %cst_109 : f32 to vector<8x128xf32>
    %256 = arith.addf %254, %255 : vector<8x128xf32>
    %257 = vector.extract_strided_slice %240 {offsets = [0, 256], sizes = [8, 128], strides = [1, 1]} : vector<8x512xf32> to vector<8x128xf32>
    %258 = math.tanh %257 : vector<8x128xf32>
    %259 = vector.extract_strided_slice %240 {offsets = [0, 384], sizes = [8, 128], strides = [1, 1]} : vector<8x512xf32> to vector<8x128xf32>
    %cst_110 = arith.constant 5.000000e-01 : f32
    %260 = vector.broadcast %cst_110 : f32 to vector<8x128xf32>
    %261 = arith.mulf %260, %259 : vector<8x128xf32>
    %262 = math.tanh %261 : vector<8x128xf32>
    %cst_111 = arith.constant 5.000000e-01 : f32
    %263 = vector.broadcast %cst_111 : f32 to vector<8x128xf32>
    %264 = arith.mulf %263, %262 : vector<8x128xf32>
    %cst_112 = arith.constant 5.000000e-01 : f32
    %265 = vector.broadcast %cst_112 : f32 to vector<8x128xf32>
    %266 = arith.addf %264, %265 : vector<8x128xf32>
    %267 = arith.mulf %256, %232 : vector<8x128xf32>
    %268 = arith.mulf %248, %258 : vector<8x128xf32>
    %269 = arith.addf %267, %268 : vector<8x128xf32>
    %270 = math.tanh %269 : vector<8x128xf32>
    %271 = arith.mulf %266, %270 : vector<8x128xf32>
    %c48_113 = arith.constant 48 : index
    %c0_114 = arith.constant 0 : index
    %272 = vector.load %arg7[%c48_113, %c0_114] : memref<64x128xf32, #tpu.memory_space<vmem>>, vector<8x128xf32>
    tpu.vector_store %arg7[%c48_113, %c0_114], %271 {strides = array<i32>} : memref<64x128xf32, #tpu.memory_space<vmem>>, vector<8x128xf32>,
    %c56 = arith.constant 56 : index
    %c0_115 = arith.constant 0 : index
    %273 = vector.load %arg6[%c56, %c0_115] : memref<64x512xf32, #tpu.memory_space<vmem>>, vector<8x512xf32>
    %274 = arith.truncf %271 : vector<8x128xf32> to vector<8x128xbf16>
    %c0_116 = arith.constant 0 : index
    %c0_117 = arith.constant 0 : index
    %275 = vector.load %arg2[%c0_116, %c0_117] : memref<128x512xbf16, #tpu.memory_space<vmem>>, vector<128x512xbf16>
    %cst_118 = arith.constant dense<0.000000e+00> : vector<8x512xf32>
    %276 = tpu.matmul %274, %275, %cst_118 {dimension_numbers = #tpu.dot_dimension_numbers<[1], [0], [0], [1], [0, 0, 1, 1], [], []>} : vector<8x128xbf16>, vector<128x512xbf16>, vector<8x512xf32> -> vector<8x512xf32>
    %277 = arith.addf %273, %276 : vector<8x512xf32>
    %278 = vector.extract_strided_slice %277 {offsets = [0, 0], sizes = [8, 128], strides = [1, 1]} : vector<8x512xf32> to vector<8x128xf32>
    %cst_119 = arith.constant 5.000000e-01 : f32
    %279 = vector.broadcast %cst_119 : f32 to vector<8x128xf32>
    %280 = arith.mulf %279, %278 : vector<8x128xf32>
    %281 = math.tanh %280 : vector<8x128xf32>
    %cst_120 = arith.constant 5.000000e-01 : f32
    %282 = vector.broadcast %cst_120 : f32 to vector<8x128xf32>
    %283 = arith.mulf %282, %281 : vector<8x128xf32>
    %cst_121 = arith.constant 5.000000e-01 : f32
    %284 = vector.broadcast %cst_121 : f32 to vector<8x128xf32>
    %285 = arith.addf %283, %284 : vector<8x128xf32>
    %286 = vector.extract_strided_slice %277 {offsets = [0, 128], sizes = [8, 128], strides = [1, 1]} : vector<8x512xf32> to vector<8x128xf32>
    %cst_122 = arith.constant 5.000000e-01 : f32
    %287 = vector.broadcast %cst_122 : f32 to vector<8x128xf32>
    %288 = arith.mulf %287, %286 : vector<8x128xf32>
    %289 = math.tanh %288 : vector<8x128xf32>
    %cst_123 = arith.constant 5.000000e-01 : f32
    %290 = vector.broadcast %cst_123 : f32 to vector<8x128xf32>
    %291 = arith.mulf %290, %289 : vector<8x128xf32>
    %cst_124 = arith.constant 5.000000e-01 : f32
    %292 = vector.broadcast %cst_124 : f32 to vector<8x128xf32>
    %293 = arith.addf %291, %292 : vector<8x128xf32>
    %294 = vector.extract_strided_slice %277 {offsets = [0, 256], sizes = [8, 128], strides = [1, 1]} : vector<8x512xf32> to vector<8x128xf32>
    %295 = math.tanh %294 : vector<8x128xf32>
    %296 = vector.extract_strided_slice %277 {offsets = [0, 384], sizes = [8, 128], strides = [1, 1]} : vector<8x512xf32> to vector<8x128xf32>
    %cst_125 = arith.constant 5.000000e-01 : f32
    %297 = vector.broadcast %cst_125 : f32 to vector<8x128xf32>
    %298 = arith.mulf %297, %296 : vector<8x128xf32>
    %299 = math.tanh %298 : vector<8x128xf32>
    %cst_126 = arith.constant 5.000000e-01 : f32
    %300 = vector.broadcast %cst_126 : f32 to vector<8x128xf32>
    %301 = arith.mulf %300, %299 : vector<8x128xf32>
    %cst_127 = arith.constant 5.000000e-01 : f32
    %302 = vector.broadcast %cst_127 : f32 to vector<8x128xf32>
    %303 = arith.addf %301, %302 : vector<8x128xf32>
    %304 = arith.mulf %293, %269 : vector<8x128xf32>
    %305 = arith.mulf %285, %295 : vector<8x128xf32>
    %306 = arith.addf %304, %305 : vector<8x128xf32>
    %307 = math.tanh %306 : vector<8x128xf32>
    %308 = arith.mulf %303, %307 : vector<8x128xf32>
    %c56_128 = arith.constant 56 : index
    %c0_129 = arith.constant 0 : index
    %309 = vector.load %arg7[%c56_128, %c0_129] : memref<64x128xf32, #tpu.memory_space<vmem>>, vector<8x128xf32>
    tpu.vector_store %arg7[%c56_128, %c0_129], %308 {strides = array<i32>} : memref<64x128xf32, #tpu.memory_space<vmem>>, vector<8x128xf32>,
    %c0_130 = arith.constant 0 : index
    %c0_131 = arith.constant 0 : index
    %310 = vector.load %arg7[%c0_130, %c0_131] : memref<64x128xf32, #tpu.memory_space<vmem>>, vector<64x128xf32>
    %311 = arith.truncf %310 : vector<64x128xf32> to vector<64x128xbf16>
    %c0_132 = arith.constant 0 : index
    %c0_133 = arith.constant 0 : index
    %312 = vector.load %arg3[%c0_132, %c0_133] : memref<128x256xbf16, #tpu.memory_space<vmem>>, vector<128x256xbf16>
    %cst_134 = arith.constant dense<0.000000e+00> : vector<64x256xf32>
    %313 = tpu.matmul %311, %312, %cst_134 {dimension_numbers = #tpu.dot_dimension_numbers<[1], [0], [0], [1], [0, 0, 1, 1], [], []>} : vector<64x128xbf16>, vector<128x256xbf16>, vector<64x256xf32> -> vector<64x256xf32>
    %c0_135 = arith.constant 0 : index
    %c0_136 = arith.constant 0 : index
    %314 = vector.load %arg4[%c0_135, %c0_136] : memref<1x256xf32, #tpu.memory_space<vmem>>, vector<1x256xf32>
    %315 = vector.broadcast %314 : vector<1x256xf32> to vector<64x256xf32>
    %316 = arith.addf %313, %315 : vector<64x256xf32>
    %c0_137 = arith.constant 0 : index
    %c0_138 = arith.constant 0 : index
    %317 = vector.load %arg5[%c0_137, %c0_138] : memref<64x256xf32, #tpu.memory_space<vmem>>, vector<64x256xf32>
    tpu.vector_store %arg5[%c0_137, %c0_138], %316 {strides = array<i32>} : memref<64x256xf32, #tpu.memory_space<vmem>>, vector<64x256xf32>,
    return
  }
}

</mosaic_0001>

<bundles_post_ra>
// kernel: music_lstm_forward.1
= control target key start
LH: loop header
LB: loop body
LE: loop exit
PB: predicated region body
PF: predicated region fallthrough
CT: control target
= control target key end

     0   :  { %v4448_v1 = vmov 0   ;;  %v3401_v19 = vmov 1   ;;  %v71_v42 = vlaneseq  ;;  %s4442_s2 = inlined_call_operand.vmem [shape: bf16[128,512], index: 2, kind: input, shape index: {}]   ;;  %s4443_s0 = inlined_call_operand.vmem [shape: f32[64,2], index: 0, kind: input, shape index: {}]   ;;  %s4444_s1 = inlined_call_operand.vmem [shape: f32[2,512], index: 1, kind: input, shape index: {}]   ;;  %s4445_s3 = inlined_call_operand.vmem [shape: bf16[128,256], index: 3, kind: input, shape index: {}]   ;;  %s4446_s4 = inlined_call_operand.vmem [shape: f32[1,256], index: 4, kind: input, shape index: {}]   ;;  %s4447_s5 = inlined_call_operand.vmem [shape: f32[64,256], index: 5, kind: output, shape index: {}]  }
   0x1   :  { %v3435_v0 = vld [vmem:[%s4442_s2 + $0x4] ss:$16 sps:$4 sm:$0xff]   ;;  %502 = vmatprep.mubr.bf16.mxu1 %v4448_v1  ;;  %3179 = vset.pattern.permute.xlu1 %v4448_v1  ;;  %v3442_v2 = vld [vmem:[%s4442_s2] ss:$16 sps:$4 sm:$0xff]   ;;  %v22_v14 = vld [vmem:[%s4443_s0 + $0x8] sm:$0xff] }
   0x2   :  { %3177 = vset.pattern.permute.xlu0 %v4448_v1  ;;  %804 = vmatprep.mubr.bf16.mxu0 %v4448_v1  ;;  %v3450_v3 = vld [vmem:[%s4442_s2 + $0x24] ss:$16 sps:$4 sm:$0xff]   ;;  %v3457_v4 = vld [vmem:[%s4442_s2 + $0x20] ss:$16 sps:$4 sm:$0xff]   ;;  %v3553_v20 = vld [vmem:[%s4442_s2 + $0xc] ss:$16 sps:$4 sm:$0xff]  }
   0x3   :  { %470 = vmatprep.subr.bf16.mxu1 %v3435_v0  ;;  %772 = vmatprep.subr.bf16.mxu0 %v3435_v0  ;;  %v3464_v5 = vld [vmem:[%s4442_s2 + $0x44] ss:$16 sps:$4 sm:$0xff]   ;;  %v3471_v6 = vld [vmem:[%s4442_s2 + $0x40] ss:$16 sps:$4 sm:$0xff]   ;;  %v3561_v22 = vld [vmem:[%s4442_s2 + $0x8] ss:$16 sps:$4 sm:$0xff]  }
   0x4   :  { %471 = vmatpush1.bf16.msra.mxu1 %v3442_v2  ;;  %773 = vmatpush1.bf16.msra.mxu0 %v3442_v2  ;;  %v3478_v7 = vld [vmem:[%s4442_s2 + $0x64] ss:$16 sps:$4 sm:$0xff]   ;;  %v3485_v8 = vld [vmem:[%s4442_s2 + $0x60] ss:$16 sps:$4 sm:$0xff]   ;;  %v3567_v23 = vld [vmem:[%s4442_s2 + $0x2c] ss:$16 sps:$4 sm:$0xff]  }
   0x5   :  { %472 = vmatprep.subr.bf16.mxu1 %v3450_v3  ;;  %774 = vmatprep.subr.bf16.mxu0 %v3450_v3  ;;  %v3492_v9 = vld [vmem:[%s4442_s2 + $0x84] ss:$16 sps:$4 sm:$0xff]   ;;  %v3499_v10 = vld [vmem:[%s4442_s2 + $0x80] ss:$16 sps:$4 sm:$0xff]   ;;  %v24_v24 = vld [vmem:[%s4443_s0 + $0x18] sm:$0xff]  ;;  %v3695_v45 = vshrl.u32 %v71_v42, 7 }
   0x6   :  { %v3506_v11 = vld [vmem:[%s4442_s2 + $0xa4] ss:$16 sps:$4 sm:$0xff]   ;;  %v3513_v12 = vld [vmem:[%s4442_s2 + $0xa0] ss:$16 sps:$4 sm:$0xff]   ;;  %37 = vperm.xlu1 %3179, %v22_v14   ;;  %v3579_v25 = vld [vmem:[%s4442_s2 + $0x28] ss:$16 sps:$4 sm:$0xff]  }
   0x7   :  { %v3520_v13 = vld [vmem:[%s4442_s2 + $0xc4] ss:$16 sps:$4 sm:$0xff]   ;;  %v3533_v16 = vld [vmem:[%s4442_s2 + $0xc0] ss:$16 sps:$4 sm:$0xff]   ;;  %v3586_v26 = vld [vmem:[%s4442_s2 + $0x4c] ss:$16 sps:$4 sm:$0xff]  }
   0x8   :  { %473 = vmatpush1.bf16.msra.mxu1 %v3457_v4  ;;  %775 = vmatpush1.bf16.msra.mxu0 %v3457_v4  ;;  %v21_v15 = vld [vmem:[%s4443_s0] sm:$0xff]  ;;  %v23_v21 = vld [vmem:[%s4443_s0 + $0x10] sm:$0xff]  ;;  %v3599_v28 = vld [vmem:[%s4442_s2 + $0x48] ss:$16 sps:$4 sm:$0xff]   ;;  %v3700_v47 = vsub.s32 0, %v3695_v45 }
   0x9   :  { %474 = vmatprep.subr.bf16.mxu1 %v3464_v5  ;;  %776 = vmatprep.subr.bf16.mxu0 %v3464_v5  ;;  %v3538_v17 = vld [vmem:[%s4442_s2 + $0xe4] ss:$16 sps:$4 sm:$0xff]   ;;  %v3546_v18 = vld [vmem:[%s4442_s2 + $0xe0] ss:$16 sps:$4 sm:$0xff]   ;;  %v3605_v29 = vld [vmem:[%s4442_s2 + $0x6c] ss:$16 sps:$4 sm:$0xff]  }
   0xa   :  { %32 = vperm.xlu0 %3177, %v21_v15   ;;  %3180 = vset.pattern.permute.xlu1 %v3401_v19  ;;  %v25_v27 = vld [vmem:[%s4443_s0 + $0x20] sm:$0xff]  ;;  %v26_v30 = vld [vmem:[%s4443_s0 + $0x28] sm:$0xff]  ;;  %v27_v33 = vld [vmem:[%s4443_s0 + $0x30] sm:$0xff]  ;;  %4477 = vst [vmem:[#allocation4_spill] sm:$0xff] %v3700_v47 }
   0xb   :  { %130 = vperm.xlu1 %3180, %v22_v14   ;;  %v3614_v31 = vld [vmem:[%s4442_s2 + $0x68] ss:$16 sps:$4 sm:$0xff]   ;;  %v3620_v32 = vld [vmem:[%s4442_s2 + $0x8c] ss:$16 sps:$4 sm:$0xff]  }
   0xc   :  { %475 = vmatpush1.bf16.msra.mxu1 %v3471_v6  ;;  %777 = vmatpush1.bf16.msra.mxu0 %v3471_v6  ;;  %v3629_v34 = vld [vmem:[%s4442_s2 + $0x88] ss:$16 sps:$4 sm:$0xff]   ;;  %v3635_v35 = vld [vmem:[%s4442_s2 + $0xac] ss:$16 sps:$4 sm:$0xff]  }
   0xd   :  { %476 = vmatprep.subr.bf16.mxu1 %v3478_v7  ;;  %778 = vmatprep.subr.bf16.mxu0 %v3478_v7  ;;  %v28_v36 = vld [vmem:[%s4443_s0 + $0x38] sm:$0xff]  ;;  %v29_v49 = vld [vmem:[%s4444_s1] ss:$2 sm:$0xf] }
   0xe   :  { %3178 = vset.pattern.permute.xlu0 %v3401_v19  ;;  %v3644_v37 = vld [vmem:[%s4442_s2 + $0xa8] ss:$16 sps:$4 sm:$0xff]   ;;  %v3650_v38 = vld [vmem:[%s4442_s2 + $0xcc] ss:$16 sps:$4 sm:$0xff]   ;;  %v74_v51 = vrot.slane %v29_v49, %v3700_v47 }
   0xf   :  { %126 = vperm.xlu0 %3178, %v21_v15   ;;  %3181 = vset.pattern.permute.xlu1 %v4448_v1  ;;  %v3656_v39 = vld [vmem:[%s4442_s2 + $0xc8] ss:$16 sps:$4 sm:$0xff]   ;;  %v3662_v40 = vld [vmem:[%s4442_s2 + $0xec] ss:$16 sps:$4 sm:$0xff]  }
  0x10   :  { %477 = vmatpush1.bf16.msra.mxu1 %v3485_v8  ;;  %779 = vmatpush1.bf16.msra.mxu0 %v3485_v8  ;;  %v3668_v41 = vld [vmem:[%s4442_s2 + $0xe8] ss:$16 sps:$4 sm:$0xff]   ;;  %v2902_v50 = vld [vmem:[%s4444_s1 + $0x1] ss:$2 sm:$0xf] }
  0x11   :  { %478 = vmatprep.subr.bf16.mxu1 %v3492_v9  ;;  %780 = vmatprep.subr.bf16.mxu0 %v3492_v9  ;;  %v161_v52 = vrot.slane %v2902_v50, %v3700_v47 }
  0x12   :  { %42 = vperm.xlu1 %3181, %v23_v21  }
  0x13   :  { %134 = vperm.xlu0 %3178, %v23_v21  }
  0x14   :  { %479 = vmatpush1.bf16.msra.mxu1 %v3499_v10  ;;  %781 = vmatpush1.bf16.msra.mxu0 %v3499_v10 }
  0x15   :  { %480 = vmatprep.subr.bf16.mxu1 %v3506_v11  ;;  %782 = vmatprep.subr.bf16.mxu0 %v3506_v11 }
  0x16   :  { %47 = vperm.xlu1 %3181, %v24_v24  }
  0x17   :  { %138 = vperm.xlu0 %3178, %v24_v24  }
  0x18   :  { %481 = vmatpush1.bf16.msra.mxu1 %v3513_v12  ;;  %783 = vmatpush1.bf16.msra.mxu0 %v3513_v12 }
  0x19   :  { %482 = vmatprep.subr.bf16.mxu1 %v3520_v13  ;;  %784 = vmatprep.subr.bf16.mxu0 %v3520_v13 }
  0x1a   :  { %52 = vperm.xlu1 %3181, %v25_v27  }
  0x1b   :  { %142 = vperm.xlu0 %3178, %v25_v27  }
  0x1c   :  { %483 = vmatpush1.bf16.msra.mxu1 %v3533_v16  ;;  %785 = vmatpush1.bf16.msra.mxu0 %v3533_v16 }
  0x1d   :  { %484 = vmatprep.subr.bf16.mxu1 %v3538_v17  ;;  %786 = vmatprep.subr.bf16.mxu0 %v3538_v17 }
  0x1e   :  { %57 = vperm.xlu1 %3181, %v26_v30  }
  0x1f   :  { %146 = vperm.xlu0 %3178, %v26_v30  }
  0x20   :  { %485 = vmatpush1.bf16.msra.mxu1 %v3546_v18  ;;  %787 = vmatpush1.bf16.msra.mxu0 %v3546_v18 }
  0x21   :  { %511 = vmatprep.subr.bf16.mxu1 %v3553_v20  ;;  %1074 = vmatprep.subr.bf16.mxu0 %v3435_v0 }
  0x22   :  { %62 = vperm.xlu1 %3181, %v27_v33  }
  0x23   :  { %503 = vmatmul.mubr.bf16.vlgmr.msra.gmra.mrb[0].mxu1 %v4448_v1  ;;  %150 = vperm.xlu0 %3178, %v27_v33  }
  0x24   :  { %512 = vmatpush1.bf16.msra.mxu1 %v3561_v22  ;;  %543 = vmatprep.mubr.bf16.mxu1 %v4448_v1 }
  0x25   :  { %513 = vmatprep.subr.bf16.mxu1 %v3567_v23 }
  0x26   :  { %67 = vperm.xlu1 %3181, %v28_v36  }
  0x27   :  { %154 = vperm.xlu0 %3178, %v28_v36  }
  0x28   :  { %514 = vmatpush1.bf16.msra.mxu1 %v3579_v25 }
  0x29   :  { %515 = vmatprep.subr.bf16.mxu1 %v3586_v26 }
  0x2c   :  { %516 = vmatpush1.bf16.msra.mxu1 %v3599_v28 }
  0x2d   :  { %517 = vmatprep.subr.bf16.mxu1 %v3605_v29 }
  0x30   :  { %518 = vmatpush1.bf16.msra.mxu1 %v3614_v31 }
  0x31   :  { %519 = vmatprep.subr.bf16.mxu1 %v3620_v32 }
  0x34   :  { %520 = vmatpush1.bf16.msra.mxu1 %v3629_v34 }
  0x35   :  { %521 = vmatprep.subr.bf16.mxu1 %v3635_v35 }
  0x38   :  { %522 = vmatpush1.bf16.msra.mxu1 %v3644_v37 }
  0x39   :  { %523 = vmatprep.subr.bf16.mxu1 %v3650_v38 }
  0x3c   :  { %524 = vmatpush1.bf16.msra.mxu1 %v3656_v39 }
  0x3d   :  { %525 = vmatprep.subr.bf16.mxu1 %v3662_v40 }
  0x40   :  { %526 = vmatpush1.bf16.msra.mxu1 %v3668_v41 }
  0x41   :  { %813 = vmatprep.subr.bf16.mxu1 %v3553_v20 }
  0x43   :  { %544 = vmatmul.mubr.bf16.vlgmr.msra.gmra.mrb[4].mxu1 %v4448_v1 }
  0x44   :  { %814 = vmatpush1.bf16.msra.mxu1 %v3561_v22  ;;  %845 = vmatprep.mubr.bf16.mxu1 %v4448_v1 }
  0x45   :  { %815 = vmatprep.subr.bf16.mxu1 %v3567_v23 }
  0x48   :  { %816 = vmatpush1.bf16.msra.mxu1 %v3579_v25 }
  0x49   :  { %817 = vmatprep.subr.bf16.mxu1 %v3586_v26 }
  0x4c   :  { %818 = vmatpush1.bf16.msra.mxu1 %v3599_v28 }
  0x4d   :  { %819 = vmatprep.subr.bf16.mxu1 %v3605_v29 }
  0x50   :  { %820 = vmatpush1.bf16.msra.mxu1 %v3614_v31 }
  0x51   :  { %821 = vmatprep.subr.bf16.mxu1 %v3620_v32 }
  0x54   :  { %822 = vmatpush1.bf16.msra.mxu1 %v3629_v34 }
  0x55   :  { %823 = vmatprep.subr.bf16.mxu1 %v3635_v35 }
  0x58   :  { %824 = vmatpush1.bf16.msra.mxu1 %v3644_v37 }
  0x59   :  { %825 = vmatprep.subr.bf16.mxu1 %v3650_v38 }
  0x5c   :  { %826 = vmatpush1.bf16.msra.mxu1 %v3656_v39 }
  0x5d   :  { %827 = vmatprep.subr.bf16.mxu1 %v3662_v40 }
  0x60   :  { %828 = vmatpush1.bf16.msra.mxu1 %v3668_v41 }
  0x61   :  { %1115 = vmatprep.subr.bf16.mxu1 %v3553_v20 }
  0x85   :  { %v3693_v44 = vpop.permute.xlu1 %37 }
  0x89   :  { %v3691_v43 = vpop.permute.xlu0 %32 }
  0x8a   :  { %v3697_v46 = vpop.permute.xlu1 %130 }
  0x8e   :  { %v3702_v48 = vpop.permute.xlu0 %126 }
  0x91   :  { %v3712_v53 = vpop.permute.xlu1 %42 }
  0x92   :  { %v3714_v54 = vpop.permute.xlu0 %134  ;;  %v99_v55 = vmul.f32 %v74_v51, %v3712_v53 }
  0x93   :  { %4478 = vst [vmem:[#allocation5_spill] sm:$0xff] %v3714_v54  ;;  %v186_v56 = vmul.f32 %v161_v52, %v3714_v54 }
  0x95   :  { %v3718_v57 = vpop.permute.xlu1 %47  ;;  %v3720_v58 = vadd.f32 %v186_v56, %v99_v55 }
  0x96   :  { %4479 = vst [vmem:[#allocation6_spill] sm:$0xff] %v3718_v57  ;;  %v3722_v59 = vpop.permute.xlu0 %138  ;;  %v103_v60 = vmul.f32 %v74_v51, %v3718_v57 }
  0x97   :  { %4480 = vst [vmem:[#allocation7_spill] sm:$0xff] %v3720_v58  ;;  %4481 = vst [vmem:[#allocation8_spill] sm:$0xff] %v3722_v59  ;;  %v190_v61 = vmul.f32 %v161_v52, %v3722_v59 }
  0x99   :  { %v3726_v62 = vpop.permute.xlu1 %52  ;;  %v3728_v63 = vadd.f32 %v190_v61, %v103_v60 }
  0x9a   :  { %4482 = vst [vmem:[#allocation9_spill] sm:$0xff] %v3726_v62  ;;  %v3730_v14 = vpop.permute.xlu0 %142  ;;  %v107_v15 = vmul.f32 %v74_v51, %v3726_v62 }
  0x9b   :  { %4483 = vst [vmem:[#allocation10_spill] sm:$0xff] %v3728_v63  ;;  %4484 = vst [vmem:[#allocation11_spill] sm:$0xff] %v3730_v14  ;;  %v194_v19 = vmul.f32 %v161_v52, %v3730_v14  ;;  %v85_v14 = vsub.s32 3, %v3695_v45 }
  0x9d   :  { %v3734_v21 = vpop.permute.xlu1 %57  ;;  %v3736_v24 = vadd.f32 %v194_v19, %v107_v15  ;;  %v3785_v57 = vrot.slane %v29_v49, %v85_v14  ;;  %v3787_v58 = vrot.slane %v2902_v50, %v85_v14 }
  0x9e   :  { %4485 = vst [vmem:[#allocation12_spill] sm:$0xff] %v3734_v21  ;;  %v3738_v27 = vpop.permute.xlu0 %146  ;;  %v111_v30 = vmul.f32 %v74_v51, %v3734_v21 }
  0x9f   :  { %4486 = vst [vmem:[#allocation13_spill] sm:$0xff] %v3736_v24  ;;  %4487 = vst [vmem:[#allocation14_spill] sm:$0xff] %v3738_v27  ;;  %v198_v33 = vmul.f32 %v161_v52, %v3738_v27  ;;  %v95_v27 = vmul.f32 %v74_v51, %v3693_v44  ;;  %v81_v24 = vsub.s32 2, %v3695_v45 }
  0xa1   :  { %v3742_v36 = vpop.permute.xlu1 %62  ;;  %v3744_v42 = vadd.f32 %v198_v33, %v111_v30  ;;  %v182_v30 = vmul.f32 %v161_v52, %v3697_v46  ;;  %v3781_v63 = vrot.slane %v29_v49, %v81_v24  ;;  %v3783_v59 = vrot.slane %v2902_v50, %v81_v24 }
  0xa2   :  { %4488 = vst [vmem:[#allocation15_spill] sm:$0xff] %v3742_v36  ;;  %v3746_v55 = vpop.permute.xlu0 %150  ;;  %v115_v56 = vmul.f32 %v74_v51, %v3742_v36 }
  0xa3   :  { %4489 = vst [vmem:[#allocation16_spill] sm:$0xff] %v3744_v42  ;;  %4490 = vst [vmem:[#allocation17_spill] sm:$0xff] %v3746_v55  ;;  %v202_v60 = vmul.f32 %v161_v52, %v3746_v55  ;;  %v3762_v42 = vadd.f32 %v182_v30, %v95_v27  ;;  %v3765_v55 = vsub.s32 1, %v3695_v45  ;;  %v91_v27 = vmul.f32 %v74_v51, %v3691_v43 }
  0xa4   :  { %v94_v45 = vmul.f32 %v3785_v57, %v3691_v43 }
  0xa5   :  { %v3750_v61 = vpop.permute.xlu1 %67  ;;  %v3752_v15 = vadd.f32 %v202_v60, %v115_v56  ;;  %4495 = vst [vmem:[#allocation22_spill] sm:$0xff] %v3765_v55 }
  0xa6   :  { %4491 = vst [vmem:[#allocation18_spill] sm:$0xff] %v3750_v61  ;;  %v119_v19 = vmul.f32 %v74_v51, %v3750_v61  ;;  %v3755_v1 = vpop.permute.xlu0 %154  ;;  %v3768_v61 = vrot.slane %v29_v49, %v3765_v55  ;;  %v93_v51 = vmul.f32 %v3781_v63, %v3691_v43 }
  0xa7   :  { %4492 = vst [vmem:[#allocation19_spill] sm:$0xff] %v3752_v15  ;;  %4493 = vst [vmem:[#allocation20_spill] sm:$0xff] %v3755_v1  ;;  %v206_v47 = vmul.f32 %v161_v52, %v3755_v1  ;;  %v3771_v1 = vrot.slane %v2902_v50, %v3765_v55 }
  0xa8   :  { %v92_v21 = vmul.f32 %v3768_v61, %v3691_v43 }
  0xa9   :  { %v3760_v33 = vadd.f32 %v206_v47, %v119_v19  ;;  %v179_v47 = vmul.f32 %v3771_v1, %v3702_v48  ;;  %v178_v19 = vmul.f32 %v161_v52, %v3702_v48  ;;  %v180_v52 = vmul.f32 %v3783_v59, %v3702_v48 }
  0xab   :  { %4494 = vst [vmem:[#allocation21_spill] sm:$0xff] %v3760_v33  ;;  %v211_v30 = vadd.f32 %v179_v47, %v92_v21  ;;  %v210_v33 = vadd.f32 %v178_v19, %v91_v27  ;;  %v181_v21 = vmul.f32 %v3787_v58, %v3702_v48  ;;  %v212_v24 = vadd.f32 %v180_v52, %v93_v51 }
  0xad   :  { %v213_v49 = vadd.f32 %v181_v21, %v94_v45 }
  0xf6   :  { %v504_v36 = vpop.f32.mrb[0].mxu1 }
  0xf7   :  { %v506_v56 = vpop.f32.mrb[1].mxu1 }
  0xf8   :  { %v508_v60 = vpop.f32.mrb[2].mxu1 }
  0xf9   :  { %v509_v15 = vpop.f32.mrb[3].mxu1  ;;  %v553_v60 = vadd.f32 %v506_v56, %v211_v30 }
  0xfa   :  { %v552_v15 = vadd.f32 %v504_v36, %v210_v33 }
  0xfb   :  { %v560_v55 = vmul.f32 0.5, %v553_v60 }
  0xfc   :  { %v556_v62 = vmul.f32 0.5, %v552_v15 }
  0xfd   :  { %3320 = vtanh.f32 %v560_v55 }
  0xfe   :  { %3322 = vtanh.f32 %v556_v62 }
 0x107   :  { %v3321_v62 = vpop.eup %3320 }
 0x108   :  { %v3323_v47 = vpop.eup %3322  ;;  %v562_v27 = vmul.f32 0.5, %v3321_v62 }
 0x109   :  { %v558_v30 = vmul.f32 0.5, %v3323_v47 }
 0x10a   :  { %v563_v60 = vadd.f32 0.5, %v562_v27 }
 0x10b   :  { %v559_v43 = vadd.f32 0.5, %v558_v30 }
 0x10c   :  { %v569_v54 = vmul.f32 0.0, %v563_v60 }
 0x116   :  { %v545_v36 = vpop.f32.mrb[4].mxu1 }
 0x117   :  { %v554_v33 = vadd.f32 %v545_v36, %v212_v24  ;;  %v547_v50 = vpop.f32.mrb[5].mxu1 }
 0x118   :  { %v555_v14 = vadd.f32 %v547_v50, %v213_v49  ;;  %v549_v55 = vpop.f32.mrb[6].mxu1  ;;  %v98_v50 = vmul.f32 %v3785_v57, %v3693_v44 }
 0x119   :  { %3324 = vtanh.f32 %v554_v33  ;;  %v550_v56 = vpop.f32.mrb[7].mxu1 }
 0x11a   :  { %v565_v19 = vmul.f32 0.5, %v555_v14  ;;  %v185_v14 = vmul.f32 %v3787_v58, %v3697_v46 }
 0x11c   :  { %3326 = vtanh.f32 %v565_v19 }
 0x123   :  { %v3325_v15 = vpop.eup %3324 }
 0x124   :  { %v570_v48 = vmul.f32 %v3325_v15, %v559_v43 }
 0x126   :  { %v3797_v51 = vadd.f32 %v570_v48, %v569_v54  ;;  %v3327_v52 = vpop.eup %3326  ;;  %v4496_v54 = vmov 0  }
 0x127   :  { %v567_v45 = vmul.f32 0.5, %v3327_v52 }
 0x128   :  { %3328 = vtanh.f32 %v3797_v51 }
 0x129   :  { %v568_v21 = vadd.f32 0.5, %v567_v45 }
 0x132   :  { %v3329_v24 = vpop.eup %3328 }
 0x133   :  { %v3800_v36 = vmul.f32 %v3329_v24, %v568_v21 }
 0x135   :  { %v579_v49 = vpack.c.bf16 %v3800_v36, %v3800_v36 }
 0x137   :  { %805 = vmatmul.mubr.bf16.vlgmr.msra.gmra.mrb[0].mxu0 %v579_v49  ;;  %846 = vmatmul.mubr.bf16.vlgmr.msra.gmra.mrb[8].mxu1 %v579_v49 }
 0x138   :  { %1075 = vmatpush1.bf16.msra.mxu0 %v3442_v2  ;;  %1116 = vmatpush1.bf16.msra.mxu1 %v3561_v22 }
 0x139   :  { %1076 = vmatprep.subr.bf16.mxu0 %v3450_v3  ;;  %1117 = vmatprep.subr.bf16.mxu1 %v3567_v23 }
 0x13a   :  { %1106 = vmatprep.mubr.bf16.mxu0 %v4496_v54  ;;  %1147 = vmatprep.mubr.bf16.mxu1 %v4496_v54 }
 0x13c   :  { %1077 = vmatpush1.bf16.msra.mxu0 %v3457_v4  ;;  %1118 = vmatpush1.bf16.msra.mxu1 %v3579_v25 }
 0x13d   :  { %1078 = vmatprep.subr.bf16.mxu0 %v3464_v5  ;;  %1119 = vmatprep.subr.bf16.mxu1 %v3586_v26  ;;  %v96_v5 = vmul.f32 %v3768_v61, %v3693_v44 }
 0x140   :  { %1079 = vmatpush1.bf16.msra.mxu0 %v3471_v6  ;;  %1120 = vmatpush1.bf16.msra.mxu1 %v3599_v28  ;;  %v183_v6 = vmul.f32 %v3771_v1, %v3697_v46 }
 0x141   :  { %1080 = vmatprep.subr.bf16.mxu0 %v3478_v7  ;;  %1121 = vmatprep.subr.bf16.mxu1 %v3605_v29  ;;  %v97_v7 = vmul.f32 %v3781_v63, %v3693_v44 }
 0x144   :  { %1081 = vmatpush1.bf16.msra.mxu0 %v3485_v8  ;;  %1122 = vmatpush1.bf16.msra.mxu1 %v3614_v31  ;;  %v184_v8 = vmul.f32 %v3783_v59, %v3697_v46 }
 0x145   :  { %1082 = vmatprep.subr.bf16.mxu0 %v3492_v9  ;;  %1123 = vmatprep.subr.bf16.mxu1 %v3620_v32 }
 0x146   :  { %v216_v33 = vadd.f32 %v184_v8, %v97_v7 }
 0x148   :  { %1083 = vmatpush1.bf16.msra.mxu0 %v3499_v10  ;;  %1124 = vmatpush1.bf16.msra.mxu1 %v3629_v34 }
 0x149   :  { %1084 = vmatprep.subr.bf16.mxu0 %v3506_v11  ;;  %1125 = vmatprep.subr.bf16.mxu1 %v3635_v35  ;;  %v215_v11 = vadd.f32 %v183_v6, %v96_v5 }
 0x14c   :  { %1085 = vmatpush1.bf16.msra.mxu0 %v3513_v12  ;;  %1126 = vmatpush1.bf16.msra.mxu1 %v3644_v37 }
 0x14d   :  { %1086 = vmatprep.subr.bf16.mxu0 %v3520_v13  ;;  %1127 = vmatprep.subr.bf16.mxu1 %v3650_v38 }
 0x150   :  { %1087 = vmatpush1.bf16.msra.mxu0 %v3533_v16  ;;  %1128 = vmatpush1.bf16.msra.mxu1 %v3656_v39 }
 0x151   :  { %1088 = vmatprep.subr.bf16.mxu0 %v3538_v17  ;;  %1129 = vmatprep.subr.bf16.mxu1 %v3662_v40 }
 0x154   :  { %1089 = vmatpush1.bf16.msra.mxu0 %v3546_v18  ;;  %1130 = vmatpush1.bf16.msra.mxu1 %v3668_v41 }
 0x155   :  { %1376 = vmatprep.subr.bf16.mxu0 %v3435_v0  ;;  %1417 = vmatprep.subr.bf16.mxu1 %v3553_v20 }
 0x20a   :  { %v806_v9 = vpop.f32.mrb[0].mxu0  ;;  %v847_v10 = vpop.f32.mrb[8].mxu1 }
 0x20b   :  { %v854_v12 = vadd.f32 %v806_v9, %v3762_v42  ;;  %v808_v0 = vpop.f32.mrb[1].mxu0  ;;  %v849_v13 = vpop.f32.mrb[9].mxu1  ;;  %v856_v47 = vadd.f32 %v847_v10, %v216_v33  ;;  %v217_v42 = vadd.f32 %v185_v14, %v98_v50  ;;  %v4499_v10 = vld [vmem:[#allocation7_spill] sm:$0xff]  ;;  %v102_v33 = vmul.f32 %v3785_v57, %v3712_v53 }
 0x20c   :  { %v855_v16 = vadd.f32 %v808_v0, %v215_v11  ;;  %v810_v17 = vpop.f32.mrb[2].mxu0  ;;  %v851_v18 = vpop.f32.mrb[10].mxu1 }
 0x20d   :  { %v858_v20 = vmul.f32 0.5, %v854_v12  ;;  %v811_v55 = vpop.f32.mrb[3].mxu0  ;;  %v852_v62 = vpop.f32.mrb[11].mxu1  ;;  %v857_v27 = vadd.f32 %v849_v13, %v217_v42 }
 0x20e   :  { %v862_v56 = vmul.f32 0.5, %v855_v16 }
 0x20f   :  { %3330 = vtanh.f32 %v858_v20  ;;  %v867_v19 = vmul.f32 0.5, %v857_v27 }
 0x210   :  { %3332 = vtanh.f32 %v862_v56 }
 0x211   :  { %3334 = vtanh.f32 %v856_v47 }
 0x212   :  { %3336 = vtanh.f32 %v867_v19 }
 0x219   :  { %v3331_v30 = vpop.eup %3330 }
 0x21a   :  { %v3333_v60 = vpop.eup %3332  ;;  %v860_v43 = vmul.f32 0.5, %v3331_v30 }
 0x21b   :  { %v864_v15 = vmul.f32 0.5, %v3333_v60  ;;  %v3335_v44 = vpop.eup %3334 }
 0x21c   :  { %v861_v48 = vadd.f32 0.5, %v860_v43  ;;  %v3337_v24 = vpop.eup %3336 }
 0x21d   :  { %v865_v52 = vadd.f32 0.5, %v864_v15  ;;  %v869_v49 = vmul.f32 0.5, %v3337_v24 }
 0x21e   :  { %v872_v45 = vmul.f32 %v3335_v44, %v861_v48 }
 0x21f   :  { %v871_v46 = vmul.f32 %v865_v52, %v3797_v51  ;;  %v870_v5 = vadd.f32 0.5, %v869_v49 }
 0x221   :  { %v3852_v21 = vadd.f32 %v872_v45, %v871_v46 }
 0x223   :  { %3338 = vtanh.f32 %v3852_v21 }
 0x22d   :  { %v3339_v6 = vpop.eup %3338 }
 0x22e   :  { %v3855_v7 = vmul.f32 %v3339_v6, %v870_v5 }
 0x230   :  { %4497 = vst [vmem:[#allocation23_spill] sm:$0xff] %v3855_v7  ;;  %v881_v8 = vpack.c.bf16 %v3855_v7, %v3855_v7 }
 0x232   :  { %1107 = vmatmul.mubr.bf16.vlgmr.msra.gmra.mrb[4].mxu0 %v881_v8  ;;  %1148 = vmatmul.mubr.bf16.vlgmr.msra.gmra.mrb[12].mxu1 %v881_v8 }
 0x233   :  { %1377 = vmatpush1.bf16.msra.mxu0 %v3442_v2  ;;  %1418 = vmatpush1.bf16.msra.mxu1 %v3561_v22  ;;  %v3882_v2 = vld [vmem:[%s4442_s2 + $0x44] ss:$16 sps:$4 sm:$0xff]   ;;  %v3899_v22 = vld [vmem:[%s4442_s2 + $0x60] ss:$16 sps:$4 sm:$0xff]  }
 0x234   :  { %1378 = vmatprep.subr.bf16.mxu0 %v3450_v3  ;;  %1419 = vmatprep.subr.bf16.mxu1 %v3567_v23  ;;  %v3887_v3 = vld [vmem:[%s4442_s2 + $0x40] ss:$16 sps:$4 sm:$0xff]   ;;  %v3906_v23 = vld [vmem:[%s4442_s2 + $0x84] ss:$16 sps:$4 sm:$0xff]  }
 0x235   :  { %1408 = vmatprep.mubr.bf16.mxu0 %v4496_v54  ;;  %1449 = vmatprep.mubr.bf16.mxu1 %v4496_v54 }
 0x237   :  { %1379 = vmatpush1.bf16.msra.mxu0 %v3457_v4  ;;  %1420 = vmatpush1.bf16.msra.mxu1 %v3579_v25  ;;  %v3894_v4 = vld [vmem:[%s4442_s2 + $0x64] ss:$16 sps:$4 sm:$0xff]   ;;  %v3911_v25 = vld [vmem:[%s4442_s2 + $0x80] ss:$16 sps:$4 sm:$0xff]  }
 0x238   :  { %1421 = vmatprep.subr.bf16.mxu1 %v3586_v26  ;;  %1380 = vmatprep.subr.bf16.mxu0 %v3882_v2  ;;  %v3918_v26 = vld [vmem:[%s4442_s2 + $0xa4] ss:$16 sps:$4 sm:$0xff]  }
 0x23b   :  { %1422 = vmatpush1.bf16.msra.mxu1 %v3599_v28  ;;  %1381 = vmatpush1.bf16.msra.mxu0 %v3887_v3  ;;  %v3923_v28 = vld [vmem:[%s4442_s2 + $0xa0] ss:$16 sps:$4 sm:$0xff]  }
 0x23c   :  { %1423 = vmatprep.subr.bf16.mxu1 %v3605_v29  ;;  %1382 = vmatprep.subr.bf16.mxu0 %v3894_v4  ;;  %v3930_v29 = vld [vmem:[%s4442_s2 + $0xc4] ss:$16 sps:$4 sm:$0xff]  }
 0x23f   :  { %1424 = vmatpush1.bf16.msra.mxu1 %v3614_v31  ;;  %1383 = vmatpush1.bf16.msra.mxu0 %v3899_v22  ;;  %v3935_v31 = vld [vmem:[%s4442_s2 + $0xc0] ss:$16 sps:$4 sm:$0xff]  }
 0x240   :  { %1425 = vmatprep.subr.bf16.mxu1 %v3620_v32  ;;  %1384 = vmatprep.subr.bf16.mxu0 %v3906_v23  ;;  %v3942_v32 = vld [vmem:[%s4442_s2 + $0xe4] ss:$16 sps:$4 sm:$0xff]  }
 0x243   :  { %1426 = vmatpush1.bf16.msra.mxu1 %v3629_v34  ;;  %1385 = vmatpush1.bf16.msra.mxu0 %v3911_v25  ;;  %v3947_v34 = vld [vmem:[%s4442_s2 + $0xe0] ss:$16 sps:$4 sm:$0xff]  }
 0x244   :  { %1427 = vmatprep.subr.bf16.mxu1 %v3635_v35  ;;  %1386 = vmatprep.subr.bf16.mxu0 %v3918_v26  ;;  %v100_v35 = vmul.f32 %v3768_v61, %v3712_v53 }
 0x247   :  { %1428 = vmatpush1.bf16.msra.mxu1 %v3644_v37  ;;  %1387 = vmatpush1.bf16.msra.mxu0 %v3923_v28  ;;  %v4498_v37 = vld [vmem:[#allocation5_spill] sm:$0xff] }
 0x248   :  { %1429 = vmatprep.subr.bf16.mxu1 %v3650_v38  ;;  %1388 = vmatprep.subr.bf16.mxu0 %v3930_v29  ;;  %v187_v38 = vmul.f32 %v3771_v1, %v4498_v37  ;;  %v189_v50 = vmul.f32 %v3787_v58, %v4498_v37 }
 0x24a   :  { %v219_v9 = vadd.f32 %v187_v38, %v100_v35  ;;  %v221_v47 = vadd.f32 %v189_v50, %v102_v33  ;;  %v3982_v35 = vld [vmem:[%s4442_s2 + $0xc] ss:$16 sps:$4 sm:$0xff]   ;;  %v3992_v38 = vld [vmem:[%s4442_s2 + $0x8] ss:$16 sps:$4 sm:$0xff]  }
 0x24b   :  { %1430 = vmatpush1.bf16.msra.mxu1 %v3656_v39  ;;  %1389 = vmatpush1.bf16.msra.mxu0 %v3935_v31  ;;  %v101_v39 = vmul.f32 %v3781_v63, %v3712_v53  ;;  %v4096_v33 = vld [vmem:[%s4442_s2 + $0xec] ss:$16 sps:$4 sm:$0xff]   ;;  %v4101_v50 = vld [vmem:[%s4442_s2 + $0xe8] ss:$16 sps:$4 sm:$0xff]  }
 0x24c   :  { %1431 = vmatprep.subr.bf16.mxu1 %v3662_v40  ;;  %1390 = vmatprep.subr.bf16.mxu0 %v3942_v32  ;;  %v188_v40 = vmul.f32 %v3783_v59, %v4498_v37  ;;  %v3987_v37 = vld [vmem:[%s4442_s2] ss:$16 sps:$4 sm:$0xff]  }
 0x24e   :  { %v220_v20 = vadd.f32 %v188_v40, %v101_v39  ;;  %v4001_v39 = vld [vmem:[%s4442_s2 + $0x24] ss:$16 sps:$4 sm:$0xff]   ;;  %v4006_v40 = vld [vmem:[%s4442_s2 + $0x2c] ss:$16 sps:$4 sm:$0xff]  }
 0x24f   :  { %1432 = vmatpush1.bf16.msra.mxu1 %v3668_v41  ;;  %1391 = vmatpush1.bf16.msra.mxu0 %v3947_v34 }
 0x250   :  { %1719 = vmatprep.subr.bf16.mxu1 %v3982_v35 }
 0x305   :  { %v1108_v41 = vpop.f32.mrb[4].mxu0  ;;  %v1149_v51 = vpop.f32.mrb[12].mxu1 }
 0x306   :  { %v1156_v11 = vadd.f32 %v1108_v41, %v4499_v10  ;;  %v1110_v12 = vpop.f32.mrb[5].mxu0  ;;  %v1151_v0 = vpop.f32.mrb[13].mxu1  ;;  %v1158_v56 = vadd.f32 %v1149_v51, %v220_v20  ;;  %v4011_v41 = vld [vmem:[%s4442_s2 + $0x20] ss:$16 sps:$4 sm:$0xff]   ;;  %v4016_v51 = vld [vmem:[%s4442_s2 + $0x28] ss:$16 sps:$4 sm:$0xff]  }
 0x307   :  { %v1157_v13 = vadd.f32 %v1110_v12, %v219_v9  ;;  %v1112_v16 = vpop.f32.mrb[6].mxu0  ;;  %v1153_v17 = vpop.f32.mrb[14].mxu1  ;;  %v1159_v42 = vadd.f32 %v1151_v0, %v221_v47  ;;  %v4026_v9 = vld [vmem:[%s4442_s2 + $0x4c] ss:$16 sps:$4 sm:$0xff]   ;;  %v4031_v10 = vld [vmem:[%s4442_s2 + $0x48] ss:$16 sps:$4 sm:$0xff]  }
 0x308   :  { %v1160_v18 = vmul.f32 0.5, %v1156_v11  ;;  %v1113_v14 = vpop.f32.mrb[7].mxu0  ;;  %v1154_v55 = vpop.f32.mrb[15].mxu1  ;;  %v4040_v11 = vld [vmem:[%s4442_s2 + $0x6c] ss:$16 sps:$4 sm:$0xff]  }
 0x309   :  { %v1164_v62 = vmul.f32 0.5, %v1157_v13  ;;  %v1169_v27 = vmul.f32 0.5, %v1159_v42  ;;  %v4045_v12 = vld [vmem:[%s4442_s2 + $0x68] ss:$16 sps:$4 sm:$0xff]   ;;  %v4054_v0 = vld [vmem:[%s4442_s2 + $0x8c] ss:$16 sps:$4 sm:$0xff]  }
 0x30a   :  { %3340 = vtanh.f32 %v1160_v18  ;;  %v4059_v13 = vld [vmem:[%s4442_s2 + $0x88] ss:$16 sps:$4 sm:$0xff]   ;;  %v4068_v16 = vld [vmem:[%s4442_s2 + $0xac] ss:$16 sps:$4 sm:$0xff]   ;;  %v4501_v14 = vld [vmem:[#allocation6_spill] sm:$0xff] }
 0x30b   :  { %3342 = vtanh.f32 %v1164_v62  ;;  %v4073_v17 = vld [vmem:[%s4442_s2 + $0xa8] ss:$16 sps:$4 sm:$0xff]   ;;  %v4082_v18 = vld [vmem:[%s4442_s2 + $0xcc] ss:$16 sps:$4 sm:$0xff]   ;;  %v104_v55 = vmul.f32 %v3768_v61, %v4501_v14  ;;  %v4502_v62 = vld [vmem:[#allocation8_spill] sm:$0xff]  ;;  %v105_v47 = vmul.f32 %v3781_v63, %v4501_v14 }
 0x30c   :  { %3344 = vtanh.f32 %v1158_v56  ;;  %v4087_v20 = vld [vmem:[%s4442_s2 + $0xc8] ss:$16 sps:$4 sm:$0xff]   ;;  %v191_v56 = vmul.f32 %v3771_v1, %v4502_v62  ;;  %v192_v42 = vmul.f32 %v3783_v59, %v4502_v62 }
 0x30d   :  { %3346 = vtanh.f32 %v1169_v27 }
 0x314   :  { %v3341_v19 = vpop.eup %3340 }
 0x315   :  { %v3343_v30 = vpop.eup %3342  ;;  %v1162_v60 = vmul.f32 0.5, %v3341_v19 }
 0x316   :  { %v1166_v43 = vmul.f32 0.5, %v3343_v30  ;;  %v3345_v53 = vpop.eup %3344  ;;  %v223_v30 = vadd.f32 %v191_v56, %v104_v55 }
 0x317   :  { %v1163_v15 = vadd.f32 0.5, %v1162_v60  ;;  %v3347_v46 = vpop.eup %3346  ;;  %v4503_v60 = vld [vmem:[#allocation10_spill] sm:$0xff] }
 0x318   :  { %v1167_v48 = vadd.f32 0.5, %v1166_v43  ;;  %v1171_v24 = vmul.f32 0.5, %v3347_v46 }
 0x319   :  { %v1174_v44 = vmul.f32 %v3345_v53, %v1163_v15 }
 0x31a   :  { %v1173_v52 = vmul.f32 %v1167_v48, %v3852_v21  ;;  %v1172_v49 = vadd.f32 0.5, %v1171_v24  ;;  %v3977_v21 = vld [vmem:[%s4442_s2 + $0x4] ss:$16 sps:$4 sm:$0xff]   ;;  %v224_v24 = vadd.f32 %v192_v42, %v105_v47 }
 0x31b   :  { %1678 = vmatprep.subr.bf16.mxu0 %v3977_v21 }
 0x31c   :  { %v3965_v45 = vadd.f32 %v1174_v44, %v1173_v52 }
 0x31e   :  { %3348 = vtanh.f32 %v3965_v45 }
 0x328   :  { %v3349_v5 = vpop.eup %3348 }
 0x329   :  { %v3968_v6 = vmul.f32 %v3349_v5, %v1172_v49  ;;  %v106_v49 = vmul.f32 %v3785_v57, %v4501_v14  ;;  %v193_v5 = vmul.f32 %v3787_v58, %v4502_v62 }
 0x32b   :  { %4500 = vst [vmem:[#allocation5_spill] sm:$0xff] %v3968_v6  ;;  %v1183_v8 = vpack.c.bf16 %v3968_v6, %v3968_v6  ;;  %v225_v56 = vadd.f32 %v193_v5, %v106_v49  ;;  %v4506_v5 = vld [vmem:[#allocation11_spill] sm:$0xff] }
 0x32d   :  { %1409 = vmatmul.mubr.bf16.vlgmr.msra.gmra.mrb[8].mxu0 %v1183_v8  ;;  %1450 = vmatmul.mubr.bf16.vlgmr.msra.gmra.mrb[16].mxu1 %v1183_v8 }
 0x32e   :  { %1710 = vmatprep.mubr.bf16.mxu0 %v4496_v54  ;;  %1751 = vmatprep.mubr.bf16.mxu1 %v4496_v54 }
 0x32f   :  { %1679 = vmatpush1.bf16.msra.mxu0 %v3987_v37  ;;  %1720 = vmatpush1.bf16.msra.mxu1 %v3992_v38 }
 0x330   :  { %1680 = vmatprep.subr.bf16.mxu0 %v4001_v39  ;;  %1721 = vmatprep.subr.bf16.mxu1 %v4006_v40 }
 0x333   :  { %1681 = vmatpush1.bf16.msra.mxu0 %v4011_v41  ;;  %1722 = vmatpush1.bf16.msra.mxu1 %v4016_v51 }
 0x334   :  { %1682 = vmatprep.subr.bf16.mxu0 %v3882_v2  ;;  %1723 = vmatprep.subr.bf16.mxu1 %v4026_v9 }
 0x337   :  { %1683 = vmatpush1.bf16.msra.mxu0 %v3887_v3  ;;  %1724 = vmatpush1.bf16.msra.mxu1 %v4031_v10 }
 0x338   :  { %1684 = vmatprep.subr.bf16.mxu0 %v3894_v4  ;;  %1725 = vmatprep.subr.bf16.mxu1 %v4040_v11 }
 0x33b   :  { %1685 = vmatpush1.bf16.msra.mxu0 %v3899_v22  ;;  %1726 = vmatpush1.bf16.msra.mxu1 %v4045_v12 }
 0x33c   :  { %1686 = vmatprep.subr.bf16.mxu0 %v3906_v23  ;;  %1727 = vmatprep.subr.bf16.mxu1 %v4054_v0 }
 0x33f   :  { %1687 = vmatpush1.bf16.msra.mxu0 %v3911_v25  ;;  %1728 = vmatpush1.bf16.msra.mxu1 %v4059_v13 }
 0x340   :  { %1688 = vmatprep.subr.bf16.mxu0 %v3918_v26  ;;  %1729 = vmatprep.subr.bf16.mxu1 %v4068_v16 }
 0x343   :  { %1689 = vmatpush1.bf16.msra.mxu0 %v3923_v28  ;;  %1730 = vmatpush1.bf16.msra.mxu1 %v4073_v17 }
 0x344   :  { %1690 = vmatprep.subr.bf16.mxu0 %v3930_v29  ;;  %1731 = vmatprep.subr.bf16.mxu1 %v4082_v18 }
 0x347   :  { %1691 = vmatpush1.bf16.msra.mxu0 %v3935_v31  ;;  %1732 = vmatpush1.bf16.msra.mxu1 %v4087_v20 }
 0x348   :  { %1692 = vmatprep.subr.bf16.mxu0 %v3942_v32  ;;  %1733 = vmatprep.subr.bf16.mxu1 %v4096_v33 }
 0x34b   :  { %1693 = vmatpush1.bf16.msra.mxu0 %v3947_v34  ;;  %1734 = vmatpush1.bf16.msra.mxu1 %v4101_v50 }
 0x34c   :  { %1980 = vmatprep.subr.bf16.mxu0 %v3977_v21  ;;  %2021 = vmatprep.subr.bf16.mxu1 %v3982_v35 }
 0x400   :  { %v1410_v27 = vpop.f32.mrb[8].mxu0  ;;  %v1451_v19 = vpop.f32.mrb[16].mxu1 }
 0x401   :  { %v1458_v43 = vadd.f32 %v1410_v27, %v4503_v60  ;;  %v1412_v15 = vpop.f32.mrb[9].mxu0  ;;  %v1453_v53 = vpop.f32.mrb[17].mxu1  ;;  %v1460_v55 = vadd.f32 %v1451_v19, %v224_v24 }
 0x402   :  { %v1459_v48 = vadd.f32 %v1412_v15, %v223_v30  ;;  %v1414_v44 = vpop.f32.mrb[10].mxu0  ;;  %v1455_v52 = vpop.f32.mrb[18].mxu1  ;;  %v1461_v27 = vadd.f32 %v1453_v53, %v225_v56  ;;  %v196_v56 = vmul.f32 %v3783_v59, %v4506_v5 }
 0x403   :  { %v1462_v46 = vmul.f32 0.5, %v1458_v43  ;;  %v1415_v8 = vpop.f32.mrb[11].mxu0  ;;  %v1456_v6 = vpop.f32.mrb[19].mxu1 }
 0x404   :  { %v1466_v7 = vmul.f32 0.5, %v1459_v48  ;;  %v1471_v30 = vmul.f32 0.5, %v1461_v27  ;;  %v195_v8 = vmul.f32 %v3771_v1, %v4506_v5 }
 0x405   :  { %3350 = vtanh.f32 %v1462_v46 }
 0x406   :  { %3352 = vtanh.f32 %v1466_v7 }
 0x407   :  { %3354 = vtanh.f32 %v1460_v55 }
 0x408   :  { %3356 = vtanh.f32 %v1471_v30 }
 0x40f   :  { %v3351_v60 = vpop.eup %3350 }
 0x410   :  { %v3353_v15 = vpop.eup %3352  ;;  %v1464_v43 = vmul.f32 0.5, %v3351_v60 }
 0x411   :  { %v1468_v47 = vmul.f32 0.5, %v3353_v15  ;;  %v3355_v14 = vpop.eup %3354  ;;  %v4507_v15 = vld [vmem:[#allocation13_spill] sm:$0xff] }
 0x412   :  { %v1465_v42 = vadd.f32 0.5, %v1464_v43  ;;  %v3357_v7 = vpop.eup %3356 }
 0x413   :  { %v1469_v44 = vadd.f32 0.5, %v1468_v47  ;;  %v1473_v19 = vmul.f32 0.5, %v3357_v7 }
 0x414   :  { %v1476_v52 = vmul.f32 %v3355_v14, %v1465_v42 }
 0x415   :  { %v1475_v62 = vmul.f32 %v1469_v44, %v3965_v45  ;;  %v1474_v48 = vadd.f32 0.5, %v1473_v19  ;;  %v4505_v45 = vld [vmem:[#allocation9_spill] sm:$0xff] }
 0x416   :  { %v108_v49 = vmul.f32 %v3768_v61, %v4505_v45  ;;  %v109_v55 = vmul.f32 %v3781_v63, %v4505_v45  ;;  %v110_v19 = vmul.f32 %v3785_v57, %v4505_v45 }
 0x417   :  { %v4122_v6 = vadd.f32 %v1476_v52, %v1475_v62 }
 0x418   :  { %v227_v60 = vadd.f32 %v195_v8, %v108_v49  ;;  %v228_v7 = vadd.f32 %v196_v56, %v109_v55 }
 0x419   :  { %3358 = vtanh.f32 %v4122_v6 }
 0x423   :  { %v3359_v53 = vpop.eup %3358 }
 0x424   :  { %v4125_v46 = vmul.f32 %v3359_v53, %v1474_v48  ;;  %v197_v48 = vmul.f32 %v3787_v58, %v4506_v5 }
 0x426   :  { %4504 = vst [vmem:[#allocation7_spill] sm:$0xff] %v4125_v46  ;;  %v1485_v24 = vpack.c.bf16 %v4125_v46, %v4125_v46  ;;  %v229_v8 = vadd.f32 %v197_v48, %v110_v19 }
 0x428   :  { %1711 = vmatmul.mubr.bf16.vlgmr.msra.gmra.mrb[12].mxu0 %v1485_v24  ;;  %1752 = vmatmul.mubr.bf16.vlgmr.msra.gmra.mrb[20].mxu1 %v1485_v24 }
 0x429   :  { %1981 = vmatpush1.bf16.msra.mxu0 %v3987_v37  ;;  %2022 = vmatpush1.bf16.msra.mxu1 %v3992_v38 }
 0x42a   :  { %1982 = vmatprep.subr.bf16.mxu0 %v4001_v39  ;;  %2023 = vmatprep.subr.bf16.mxu1 %v4006_v40 }
 0x42b   :  { %2012 = vmatprep.mubr.bf16.mxu0 %v4496_v54  ;;  %2053 = vmatprep.mubr.bf16.mxu1 %v4496_v54 }
 0x42d   :  { %1983 = vmatpush1.bf16.msra.mxu0 %v4011_v41  ;;  %2024 = vmatpush1.bf16.msra.mxu1 %v4016_v51 }
 0x42e   :  { %1984 = vmatprep.subr.bf16.mxu0 %v3882_v2  ;;  %2025 = vmatprep.subr.bf16.mxu1 %v4026_v9 }
 0x431   :  { %1985 = vmatpush1.bf16.msra.mxu0 %v3887_v3  ;;  %2026 = vmatpush1.bf16.msra.mxu1 %v4031_v10 }
 0x432   :  { %1986 = vmatprep.subr.bf16.mxu0 %v3894_v4  ;;  %2027 = vmatprep.subr.bf16.mxu1 %v4040_v11 }
 0x435   :  { %1987 = vmatpush1.bf16.msra.mxu0 %v3899_v22  ;;  %2028 = vmatpush1.bf16.msra.mxu1 %v4045_v12 }
 0x436   :  { %1988 = vmatprep.subr.bf16.mxu0 %v3906_v23  ;;  %2029 = vmatprep.subr.bf16.mxu1 %v4054_v0 }
 0x439   :  { %1989 = vmatpush1.bf16.msra.mxu0 %v3911_v25  ;;  %2030 = vmatpush1.bf16.msra.mxu1 %v4059_v13 }
 0x43a   :  { %1990 = vmatprep.subr.bf16.mxu0 %v3918_v26  ;;  %2031 = vmatprep.subr.bf16.mxu1 %v4068_v16 }
 0x43d   :  { %1991 = vmatpush1.bf16.msra.mxu0 %v3923_v28  ;;  %2032 = vmatpush1.bf16.msra.mxu1 %v4073_v17 }
 0x43e   :  { %1992 = vmatprep.subr.bf16.mxu0 %v3930_v29  ;;  %2033 = vmatprep.subr.bf16.mxu1 %v4082_v18 }
 0x441   :  { %1993 = vmatpush1.bf16.msra.mxu0 %v3935_v31  ;;  %2034 = vmatpush1.bf16.msra.mxu1 %v4087_v20 }
 0x442   :  { %1994 = vmatprep.subr.bf16.mxu0 %v3942_v32  ;;  %2035 = vmatprep.subr.bf16.mxu1 %v4096_v33 }
 0x445   :  { %1995 = vmatpush1.bf16.msra.mxu0 %v3947_v34  ;;  %2036 = vmatpush1.bf16.msra.mxu1 %v4101_v50 }
 0x446   :  { %2282 = vmatprep.subr.bf16.mxu0 %v3977_v21  ;;  %2323 = vmatprep.subr.bf16.mxu1 %v3982_v35 }
 0x4fb   :  { %v1712_v27 = vpop.f32.mrb[12].mxu0  ;;  %v1753_v30 = vpop.f32.mrb[20].mxu1 }
 0x4fc   :  { %v1760_v43 = vadd.f32 %v1712_v27, %v4507_v15  ;;  %v1714_v47 = vpop.f32.mrb[13].mxu0  ;;  %v1755_v42 = vpop.f32.mrb[21].mxu1  ;;  %v1762_v49 = vadd.f32 %v1753_v30, %v228_v7 }
 0x4fd   :  { %v1761_v14 = vadd.f32 %v1714_v47, %v227_v60  ;;  %v1716_v44 = vpop.f32.mrb[14].mxu0  ;;  %v1757_v52 = vpop.f32.mrb[22].mxu1  ;;  %v1763_v27 = vadd.f32 %v1755_v42, %v229_v8 }
 0x4fe   :  { %v1764_v62 = vmul.f32 0.5, %v1760_v43  ;;  %v1717_v53 = vpop.f32.mrb[15].mxu0  ;;  %v1758_v24 = vpop.f32.mrb[23].mxu1 }
 0x4ff   :  { %v1768_v46 = vmul.f32 0.5, %v1761_v14  ;;  %v1773_v60 = vmul.f32 0.5, %v1763_v27 }
 0x500   :  { %3360 = vtanh.f32 %v1764_v62 }
 0x501   :  { %3362 = vtanh.f32 %v1768_v46 }
 0x502   :  { %3364 = vtanh.f32 %v1762_v49 }
 0x503   :  { %3366 = vtanh.f32 %v1773_v60 }
 0x50a   :  { %v3361_v15 = vpop.eup %3360 }
 0x50b   :  { %v3363_v47 = vpop.eup %3362  ;;  %v1766_v43 = vmul.f32 0.5, %v3361_v15 }
 0x50c   :  { %v1770_v55 = vmul.f32 0.5, %v3363_v47  ;;  %v3365_v45 = vpop.eup %3364 }
 0x50d   :  { %v1767_v56 = vadd.f32 0.5, %v1766_v43  ;;  %v3367_v46 = vpop.eup %3366 }
 0x50e   :  { %v1771_v44 = vadd.f32 0.5, %v1770_v55  ;;  %v1775_v30 = vmul.f32 0.5, %v3367_v46 }
 0x50f   :  { %v1778_v52 = vmul.f32 %v3365_v45, %v1767_v56 }
 0x510   :  { %v1777_v5 = vmul.f32 %v1771_v44, %v4122_v6  ;;  %v1776_v14 = vadd.f32 0.5, %v1775_v30 }
 0x512   :  { %v4177_v53 = vadd.f32 %v1778_v52, %v1777_v5 }
 0x514   :  { %3368 = vtanh.f32 %v4177_v53 }
 0x51e   :  { %v3369_v42 = vpop.eup %3368 }
 0x51f   :  { %v4180_v62 = vmul.f32 %v3369_v42, %v1776_v14 }
 0x521   :  { %v1787_v7 = vpack.c.bf16 %v4180_v62, %v4180_v62 }
 0x523   :  { %2013 = vmatmul.mubr.bf16.vlgmr.msra.gmra.mrb[16].mxu0 %v1787_v7  ;;  %2054 = vmatmul.mubr.bf16.vlgmr.msra.gmra.mrb[24].mxu1 %v1787_v7 }
 0x524   :  { %2283 = vmatpush1.bf16.msra.mxu0 %v3987_v37  ;;  %2324 = vmatpush1.bf16.msra.mxu1 %v3992_v38 }
 0x525   :  { %2284 = vmatprep.subr.bf16.mxu0 %v4001_v39  ;;  %2325 = vmatprep.subr.bf16.mxu1 %v4006_v40 }
 0x526   :  { %2314 = vmatprep.mubr.bf16.mxu0 %v4496_v54  ;;  %2355 = vmatprep.mubr.bf16.mxu1 %v4496_v54 }
 0x528   :  { %2285 = vmatpush1.bf16.msra.mxu0 %v4011_v41  ;;  %2326 = vmatpush1.bf16.msra.mxu1 %v4016_v51 }
 0x529   :  { %2286 = vmatprep.subr.bf16.mxu0 %v3882_v2  ;;  %2327 = vmatprep.subr.bf16.mxu1 %v4026_v9  ;;  %v4508_v2 = vld [vmem:[#allocation12_spill] sm:$0xff] }
 0x52a   :  { %v114_v49 = vmul.f32 %v3785_v57, %v4508_v2 }
 0x52c   :  { %2287 = vmatpush1.bf16.msra.mxu0 %v3887_v3  ;;  %2328 = vmatpush1.bf16.msra.mxu1 %v4031_v10  ;;  %v112_v3 = vmul.f32 %v3768_v61, %v4508_v2 }
 0x52d   :  { %2288 = vmatprep.subr.bf16.mxu0 %v3894_v4  ;;  %2329 = vmatprep.subr.bf16.mxu1 %v4040_v11  ;;  %v4509_v4 = vld [vmem:[#allocation14_spill] sm:$0xff] }
 0x52e   :  { %v201_v8 = vmul.f32 %v3787_v58, %v4509_v4 }
 0x530   :  { %2289 = vmatpush1.bf16.msra.mxu0 %v3899_v22  ;;  %2330 = vmatpush1.bf16.msra.mxu1 %v4045_v12  ;;  %v199_v22 = vmul.f32 %v3771_v1, %v4509_v4  ;;  %v233_v43 = vadd.f32 %v201_v8, %v114_v49 }
 0x531   :  { %2290 = vmatprep.subr.bf16.mxu0 %v3906_v23  ;;  %2331 = vmatprep.subr.bf16.mxu1 %v4054_v0  ;;  %v113_v23 = vmul.f32 %v3781_v63, %v4508_v2 }
 0x534   :  { %2291 = vmatpush1.bf16.msra.mxu0 %v3911_v25  ;;  %2332 = vmatpush1.bf16.msra.mxu1 %v4059_v13  ;;  %v200_v25 = vmul.f32 %v3783_v59, %v4509_v4 }
 0x535   :  { %2292 = vmatprep.subr.bf16.mxu0 %v3918_v26  ;;  %2333 = vmatprep.subr.bf16.mxu1 %v4068_v16 }
 0x536   :  { %v232_v24 = vadd.f32 %v200_v25, %v113_v23 }
 0x538   :  { %2293 = vmatpush1.bf16.msra.mxu0 %v3923_v28  ;;  %2334 = vmatpush1.bf16.msra.mxu1 %v4073_v17 }
 0x539   :  { %2294 = vmatprep.subr.bf16.mxu0 %v3930_v29  ;;  %2335 = vmatprep.subr.bf16.mxu1 %v4082_v18  ;;  %v231_v29 = vadd.f32 %v199_v22, %v112_v3 }
 0x53c   :  { %2295 = vmatpush1.bf16.msra.mxu0 %v3935_v31  ;;  %2336 = vmatpush1.bf16.msra.mxu1 %v4087_v20  ;;  %v4510_v31 = vld [vmem:[#allocation16_spill] sm:$0xff] }
 0x53d   :  { %2296 = vmatprep.subr.bf16.mxu0 %v3942_v32  ;;  %2337 = vmatprep.subr.bf16.mxu1 %v4096_v33 }
 0x540   :  { %2297 = vmatpush1.bf16.msra.mxu0 %v3947_v34  ;;  %2338 = vmatpush1.bf16.msra.mxu1 %v4101_v50 }
 0x541   :  { %2584 = vmatprep.subr.bf16.mxu0 %v3977_v21  ;;  %2625 = vmatprep.subr.bf16.mxu1 %v3982_v35 }
 0x5f6   :  { %v2014_v26 = vpop.f32.mrb[16].mxu0  ;;  %v2055_v28 = vpop.f32.mrb[24].mxu1 }
 0x5f7   :  { %v2062_v32 = vadd.f32 %v2014_v26, %v4510_v31  ;;  %v2016_v34 = vpop.f32.mrb[17].mxu0  ;;  %v2057_v21 = vpop.f32.mrb[25].mxu1  ;;  %v2064_v47 = vadd.f32 %v2055_v28, %v232_v24 }
 0x5f8   :  { %v2063_v35 = vadd.f32 %v2016_v34, %v231_v29  ;;  %v2018_v6 = vpop.f32.mrb[18].mxu0  ;;  %v2059_v19 = vpop.f32.mrb[26].mxu1  ;;  %v2065_v55 = vadd.f32 %v2057_v21, %v233_v43 }
 0x5f9   :  { %v2066_v48 = vmul.f32 0.5, %v2062_v32  ;;  %v2019_v27 = vpop.f32.mrb[19].mxu0  ;;  %v2060_v60 = vpop.f32.mrb[27].mxu1  ;;  %v4513_v32 = vld [vmem:[#allocation19_spill] sm:$0xff] }
 0x5fa   :  { %v2070_v15 = vmul.f32 0.5, %v2063_v35  ;;  %v2075_v56 = vmul.f32 0.5, %v2065_v55 }
 0x5fb   :  { %3370 = vtanh.f32 %v2066_v48 }
 0x5fc   :  { %3372 = vtanh.f32 %v2070_v15 }
 0x5fd   :  { %3374 = vtanh.f32 %v2064_v47 }
 0x5fe   :  { %3376 = vtanh.f32 %v2075_v56 }
 0x605   :  { %v3371_v45 = vpop.eup %3370 }
 0x606   :  { %v3373_v44 = vpop.eup %3372  ;;  %v2068_v52 = vmul.f32 0.5, %v3371_v45 }
 0x607   :  { %v2072_v5 = vmul.f32 0.5, %v3373_v44  ;;  %v3375_v30 = vpop.eup %3374 }
 0x608   :  { %v2069_v46 = vadd.f32 0.5, %v2068_v52  ;;  %v3377_v3 = vpop.eup %3376 }
 0x609   :  { %v2073_v14 = vadd.f32 0.5, %v2072_v5  ;;  %v2077_v4 = vmul.f32 0.5, %v3377_v3 }
 0x60a   :  { %v2080_v42 = vmul.f32 %v3375_v30, %v2069_v46 }
 0x60b   :  { %v2079_v7 = vmul.f32 %v2073_v14, %v4177_v53  ;;  %v2078_v22 = vadd.f32 0.5, %v2077_v4 }
 0x60d   :  { %v4232_v2 = vadd.f32 %v2080_v42, %v2079_v7 }
 0x60f   :  { %3378 = vtanh.f32 %v4232_v2 }
 0x619   :  { %v3379_v23 = vpop.eup %3378 }
 0x61a   :  { %v4235_v25 = vmul.f32 %v3379_v23, %v2078_v22 }
 0x61c   :  { %v2089_v26 = vpack.c.bf16 %v4235_v25, %v4235_v25 }
 0x61e   :  { %2315 = vmatmul.mubr.bf16.vlgmr.msra.gmra.mrb[20].mxu0 %v2089_v26  ;;  %2356 = vmatmul.mubr.bf16.vlgmr.msra.gmra.mrb[28].mxu1 %v2089_v26 }
 0x61f   :  { %2585 = vmatpush1.bf16.msra.mxu0 %v3987_v37  ;;  %2626 = vmatpush1.bf16.msra.mxu1 %v3992_v38  ;;  %v3280_v37 = vld [vmem:[%s4442_s2 + $0x44] ss:$16 sps:$4 sm:$0xff]   ;;  %v3278_v38 = vld [vmem:[%s4442_s2 + $0x40] ss:$16 sps:$4 sm:$0xff]  }
 0x620   :  { %2586 = vmatprep.subr.bf16.mxu0 %v4001_v39  ;;  %2627 = vmatprep.subr.bf16.mxu1 %v4006_v40  ;;  %v3283_v39 = vld [vmem:[%s4442_s2 + $0x64] ss:$16 sps:$4 sm:$0xff]   ;;  %v3281_v40 = vld [vmem:[%s4442_s2 + $0x60] ss:$16 sps:$4 sm:$0xff]  }
 0x621   :  { %2616 = vmatprep.mubr.bf16.mxu0 %v4496_v54  ;;  %2657 = vmatprep.mubr.bf16.mxu1 %v4496_v54 }
 0x623   :  { %2587 = vmatpush1.bf16.msra.mxu0 %v4011_v41  ;;  %2628 = vmatpush1.bf16.msra.mxu1 %v4016_v51  ;;  %v3286_v41 = vld [vmem:[%s4442_s2 + $0x84] ss:$16 sps:$4 sm:$0xff]   ;;  %v3284_v51 = vld [vmem:[%s4442_s2 + $0x80] ss:$16 sps:$4 sm:$0xff]  }
 0x624   :  { %2629 = vmatprep.subr.bf16.mxu1 %v4026_v9  ;;  %2588 = vmatprep.subr.bf16.mxu0 %v3280_v37  ;;  %v3289_v9 = vld [vmem:[%s4442_s2 + $0xa4] ss:$16 sps:$4 sm:$0xff]  }
 0x627   :  { %2630 = vmatpush1.bf16.msra.mxu1 %v4031_v10  ;;  %2589 = vmatpush1.bf16.msra.mxu0 %v3278_v38  ;;  %v3287_v10 = vld [vmem:[%s4442_s2 + $0xa0] ss:$16 sps:$4 sm:$0xff]  }
 0x628   :  { %2631 = vmatprep.subr.bf16.mxu1 %v4040_v11  ;;  %2590 = vmatprep.subr.bf16.mxu0 %v3283_v39  ;;  %v3292_v11 = vld [vmem:[%s4442_s2 + $0xc4] ss:$16 sps:$4 sm:$0xff]   ;;  %v3296_v39 = vld [vmem:[%s4445_s3] ss:$8 sps:$4 sm:$0xff]  }
 0x62b   :  { %2632 = vmatpush1.bf16.msra.mxu1 %v4045_v12  ;;  %2591 = vmatpush1.bf16.msra.mxu0 %v3281_v40  ;;  %v3290_v12 = vld [vmem:[%s4442_s2 + $0xc0] ss:$16 sps:$4 sm:$0xff]  }
 0x62c   :  { %2633 = vmatprep.subr.bf16.mxu1 %v4054_v0  ;;  %2592 = vmatprep.subr.bf16.mxu0 %v3286_v41  ;;  %v3295_v0 = vld [vmem:[%s4442_s2 + $0xe4] ss:$16 sps:$4 sm:$0xff]   ;;  %v3299_v41 = vld [vmem:[%s4445_s3 + $0x10] ss:$8 sps:$4 sm:$0xff]  }
 0x62f   :  { %2634 = vmatpush1.bf16.msra.mxu1 %v4059_v13  ;;  %2593 = vmatpush1.bf16.msra.mxu0 %v3284_v51  ;;  %v3293_v13 = vld [vmem:[%s4442_s2 + $0xe0] ss:$16 sps:$4 sm:$0xff]   ;;  %v3304_v51 = vld [vmem:[%s4445_s3 + $0x24] ss:$8 sps:$4 sm:$0xff]  }
 0x630   :  { %2635 = vmatprep.subr.bf16.mxu1 %v4068_v16  ;;  %2594 = vmatprep.subr.bf16.mxu0 %v3289_v9  ;;  %v3298_v16 = vld [vmem:[%s4445_s3 + $0x4] ss:$8 sps:$4 sm:$0xff]   ;;  %v3302_v9 = vld [vmem:[%s4445_s3 + $0x20] ss:$8 sps:$4 sm:$0xff]  }
 0x633   :  { %2636 = vmatpush1.bf16.msra.mxu1 %v4073_v17  ;;  %2595 = vmatpush1.bf16.msra.mxu0 %v3287_v10  ;;  %v4511_v17 = vld [vmem:[#allocation15_spill] sm:$0xff] }
 0x634   :  { %2637 = vmatprep.subr.bf16.mxu1 %v4082_v18  ;;  %2596 = vmatprep.subr.bf16.mxu0 %v3292_v11  ;;  %v116_v18 = vmul.f32 %v3768_v61, %v4511_v17  ;;  %v118_v8 = vmul.f32 %v3785_v57, %v4511_v17  ;;  %v3307_v10 = vld [vmem:[%s4445_s3 + $0x34] ss:$8 sps:$4 sm:$0xff]   ;;  %v3305_v11 = vld [vmem:[%s4445_s3 + $0x30] ss:$8 sps:$4 sm:$0xff]  }
 0x637   :  { %2638 = vmatpush1.bf16.msra.mxu1 %v4087_v20  ;;  %2597 = vmatpush1.bf16.msra.mxu0 %v3290_v12  ;;  %v4512_v20 = vld [vmem:[#allocation17_spill] sm:$0xff] }
 0x638   :  { %2639 = vmatprep.subr.bf16.mxu1 %v4096_v33  ;;  %2598 = vmatprep.subr.bf16.mxu0 %v3295_v0  ;;  %v203_v33 = vmul.f32 %v3771_v1, %v4512_v20  ;;  %v204_v53 = vmul.f32 %v3783_v59, %v4512_v20  ;;  %v205_v27 = vmul.f32 %v3787_v58, %v4512_v20  ;;  %v3310_v12 = vld [vmem:[%s4445_s3 + $0x44] ss:$8 sps:$4 sm:$0xff]   ;;  %v3308_v0 = vld [vmem:[%s4445_s3 + $0x40] ss:$8 sps:$4 sm:$0xff]   ;;  %v3319_v20 = vld [vmem:[%s4445_s3 + $0x74] ss:$8 sps:$4 sm:$0xff]  }
 0x63a   :  { %v235_v31 = vadd.f32 %v203_v33, %v116_v18  ;;  %v237_v55 = vadd.f32 %v205_v27, %v118_v8  ;;  %v3314_v18 = vld [vmem:[%s4445_s3 + $0x60] ss:$8 sps:$4 sm:$0xff]   ;;  %v3317_v33 = vld [vmem:[%s4445_s3 + $0x70] ss:$8 sps:$4 sm:$0xff]  }
 0x63b   :  { %2640 = vmatpush1.bf16.msra.mxu1 %v4101_v50  ;;  %2599 = vmatpush1.bf16.msra.mxu0 %v3293_v13  ;;  %v117_v50 = vmul.f32 %v3781_v63, %v4511_v17  ;;  %v3313_v13 = vld [vmem:[%s4445_s3 + $0x54] ss:$8 sps:$4 sm:$0xff]   ;;  %v3316_v17 = vld [vmem:[%s4445_s3 + $0x64] ss:$8 sps:$4 sm:$0xff]  }
 0x63c   :  { %2809 = vmatprep.subr.bf16.mxu0 %v3298_v16  ;;  %v3311_v16 = vld [vmem:[%s4445_s3 + $0x50] ss:$8 sps:$4 sm:$0xff]   ;;  %v4519_v8 = vld [vmem:[#allocation21_spill] sm:$0xff] }
 0x63d   :  { %v236_v49 = vadd.f32 %v204_v53, %v117_v50  ;;  %v4514_v50 = vld [vmem:[#allocation23_spill] sm:$0xff] }
 0x63e   :  { %v2697_v53 = vpack.c.bf16 %v4514_v50, %v3800_v36 }
 0x6f1   :  { %v2316_v28 = vpop.f32.mrb[20].mxu0  ;;  %v2357_v29 = vpop.f32.mrb[28].mxu1 }
 0x6f2   :  { %v2364_v34 = vadd.f32 %v2316_v28, %v4513_v32  ;;  %v2318_v21 = vpop.f32.mrb[21].mxu0  ;;  %v2359_v35 = vpop.f32.mrb[29].mxu1  ;;  %v2366_v43 = vadd.f32 %v2357_v29, %v236_v49  ;;  %v4515_v28 = vld [vmem:[#allocation5_spill] sm:$0xff]  ;;  %v4516_v29 = vld [vmem:[#allocation7_spill] sm:$0xff]  ;;  %v2699_v32 = vpack.c.bf16 %v4235_v25, %v4180_v62 }
 0x6f3   :  { %v2365_v6 = vadd.f32 %v2318_v21, %v235_v31  ;;  %v2320_v19 = vpop.f32.mrb[22].mxu0  ;;  %v2361_v48 = vpop.f32.mrb[30].mxu1  ;;  %v2367_v56 = vadd.f32 %v2359_v35, %v237_v55  ;;  %v2698_v31 = vpack.c.bf16 %v4516_v29, %v4515_v28  ;;  %v4518_v35 = vld [vmem:[#allocation20_spill] sm:$0xff] }
 0x6f4   :  { %v2368_v24 = vmul.f32 0.5, %v2364_v34  ;;  %v2321_v60 = vpop.f32.mrb[23].mxu0  ;;  %v2362_v15 = vpop.f32.mrb[31].mxu1  ;;  %v4517_v34 = vld [vmem:[#allocation18_spill] sm:$0xff]  ;;  %v207_v36 = vmul.f32 %v3771_v1, %v4518_v35  ;;  %v208_v19 = vmul.f32 %v3783_v59, %v4518_v35  ;;  %v209_v1 = vmul.f32 %v3787_v58, %v4518_v35 }
 0x6f5   :  { %v2372_v47 = vmul.f32 0.5, %v2365_v6  ;;  %v2377_v45 = vmul.f32 0.5, %v2367_v56  ;;  %v120_v21 = vmul.f32 %v3768_v61, %v4517_v34  ;;  %v121_v6 = vmul.f32 %v3781_v63, %v4517_v34 }
 0x6f6   :  { %3380 = vtanh.f32 %v2368_v24  ;;  %v122_v61 = vmul.f32 %v3785_v57, %v4517_v34 }
 0x6f7   :  { %3382 = vtanh.f32 %v2372_v47  ;;  %v239_v49 = vadd.f32 %v207_v36, %v120_v21  ;;  %v240_v47 = vadd.f32 %v208_v19, %v121_v6 }
 0x6f8   :  { %3384 = vtanh.f32 %v2366_v43 }
 0x6f9   :  { %3386 = vtanh.f32 %v2377_v45  ;;  %v241_v45 = vadd.f32 %v209_v1, %v122_v61 }
 0x700   :  { %v3381_v44 = vpop.eup %3380 }
 0x701   :  { %v3383_v52 = vpop.eup %3382  ;;  %v2370_v5 = vmul.f32 0.5, %v3381_v44 }
 0x702   :  { %v2374_v46 = vmul.f32 0.5, %v3383_v52  ;;  %v3385_v14 = vpop.eup %3384 }
 0x703   :  { %v2371_v30 = vadd.f32 0.5, %v2370_v5  ;;  %v3387_v22 = vpop.eup %3386 }
 0x704   :  { %v2375_v42 = vadd.f32 0.5, %v2374_v46  ;;  %v2379_v23 = vmul.f32 0.5, %v3387_v22 }
 0x705   :  { %v2382_v7 = vmul.f32 %v3385_v14, %v2371_v30 }
 0x706   :  { %v2381_v3 = vmul.f32 %v2375_v42, %v4232_v2  ;;  %v2380_v26 = vadd.f32 0.5, %v2379_v23  ;;  %v3301_v2 = vld [vmem:[%s4445_s3 + $0x14] ss:$8 sps:$4 sm:$0xff]   ;;  %v2717_v23 = vld [vmem:[%s4446_s4] sm:$0x3] }
 0x708   :  { %v4312_v4 = vadd.f32 %v2382_v7, %v2381_v3 }
 0x70a   :  { %3388 = vtanh.f32 %v4312_v4 }
 0x714   :  { %v3389_v37 = vpop.eup %3388 }
 0x715   :  { %v4315_v38 = vmul.f32 %v3389_v37, %v2380_v26  ;;  %v4520_v37 = vld [vmem:[#allocation4_spill] sm:$0xff] }
 0x717   :  { %v2391_v40 = vpack.c.bf16 %v4315_v38, %v4315_v38 }
 0x719   :  { %2617 = vmatmul.mubr.bf16.vlgmr.msra.gmra.mrb[24].mxu0 %v2391_v40  ;;  %2658 = vmatmul.mubr.bf16.vlgmr.msra.gmra.mrb[32].mxu1 %v2391_v40 }
 0x71a   :  { %2810 = vmatpush1.bf16.msra.mxu0 %v3296_v39  ;;  %2841 = vmatprep.mubr.bf16.mxu0 %v4496_v54  ;;  %v2722_v39 = vrot.slane %v2717_v23, %v4520_v37 }
 0x71b   :  { %2811 = vmatprep.subr.bf16.mxu0 %v3301_v2  ;;  %v4521_v2 = vld [vmem:[#allocation22_spill] sm:$0xff] }
 0x71e   :  { %2812 = vmatpush1.bf16.msra.mxu0 %v3299_v41  ;;  %v2726_v41 = vrot.slane %v2717_v23, %v4521_v2 }
 0x71f   :  { %2813 = vmatprep.subr.bf16.mxu0 %v3304_v51 }
 0x722   :  { %2814 = vmatpush1.bf16.msra.mxu0 %v3302_v9 }
 0x723   :  { %2815 = vmatprep.subr.bf16.mxu0 %v3307_v10 }
 0x726   :  { %2816 = vmatpush1.bf16.msra.mxu0 %v3305_v11 }
 0x727   :  { %2817 = vmatprep.subr.bf16.mxu0 %v3310_v12 }
 0x72a   :  { %2818 = vmatpush1.bf16.msra.mxu0 %v3308_v0 }
 0x72b   :  { %2819 = vmatprep.subr.bf16.mxu0 %v3313_v13 }
 0x72e   :  { %2820 = vmatpush1.bf16.msra.mxu0 %v3311_v16 }
 0x72f   :  { %2821 = vmatprep.subr.bf16.mxu0 %v3316_v17 }
 0x732   :  { %2822 = vmatpush1.bf16.msra.mxu0 %v3314_v18 }
 0x733   :  { %2823 = vmatprep.subr.bf16.mxu0 %v3319_v20 }
 0x736   :  { %2824 = vmatpush1.bf16.msra.mxu0 %v3317_v33 }
 0x739   :  { %2842 = vmatmul.mubr.bf16.vlgmr.msra.gmra.mrb[28].mxu0 %v2697_v53 }
 0x73a   :  { %2851 = vmatprep.mubr.bf16.mxu0 %v4496_v54 }
 0x741   :  { %2852 = vmatmul.mubr.bf16.gmra.mrb[32].mxu0 %v2698_v31 }
 0x742   :  { %2861 = vmatprep.mubr.bf16.mxu0 %v4496_v54 }
 0x749   :  { %2862 = vmatmul.mubr.bf16.gmra.mrb[36].mxu0 %v2699_v32 }
 0x74a   :  { %2871 = vmatprep.mubr.bf16.mxu0 %v4496_v54 }
 0x7ec   :  { %v2618_v48 = vpop.f32.mrb[24].mxu0  ;;  %v2659_v24 = vpop.f32.mrb[32].mxu1 }
 0x7ed   :  { %v2666_v62 = vadd.f32 %v2618_v48, %v4519_v8  ;;  %v2620_v25 = vpop.f32.mrb[25].mxu0  ;;  %v2661_v27 = vpop.f32.mrb[33].mxu1  ;;  %v2668_v56 = vadd.f32 %v2659_v24, %v240_v47 }
 0x7ee   :  { %v2667_v54 = vadd.f32 %v2620_v25, %v239_v49  ;;  %v2622_v60 = vpop.f32.mrb[26].mxu0  ;;  %v2663_v15 = vpop.f32.mrb[34].mxu1  ;;  %v2669_v44 = vadd.f32 %v2661_v27, %v241_v45 }
 0x7ef   :  { %v2670_v63 = vmul.f32 0.5, %v2666_v62  ;;  %v2623_v43 = vpop.f32.mrb[27].mxu0  ;;  %v2664_v59 = vpop.f32.mrb[35].mxu1 }
 0x7f0   :  { %v2674_v55 = vmul.f32 0.5, %v2667_v54  ;;  %v2679_v52 = vmul.f32 0.5, %v2669_v44 }
 0x7f1   :  { %3390 = vtanh.f32 %v2670_v63 }
 0x7f2   :  { %3392 = vtanh.f32 %v2674_v55 }
 0x7f3   :  { %3394 = vtanh.f32 %v2668_v56 }
 0x7f4   :  { %3396 = vtanh.f32 %v2679_v52 }
 0x7fb   :  { %v3391_v5 = vpop.eup %3390 }
 0x7fc   :  { %v3393_v46 = vpop.eup %3392  ;;  %v2672_v30 = vmul.f32 0.5, %v3391_v5 }
 0x7fd   :  { %v2676_v14 = vmul.f32 0.5, %v3393_v46  ;;  %v3395_v42 = vpop.eup %3394 }
 0x7fe   :  { %v2673_v57 = vadd.f32 0.5, %v2672_v30  ;;  %v3397_v26 = vpop.eup %3396 }
 0x7ff   :  { %v2677_v58 = vadd.f32 0.5, %v2676_v14  ;;  %v2681_v40 = vmul.f32 0.5, %v3397_v26 }
 0x800   :  { %v2684_v7 = vmul.f32 %v3395_v42, %v2673_v57 }
 0x801   :  { %v2683_v3 = vmul.f32 %v2677_v58, %v4312_v4  ;;  %v2682_v11 = vadd.f32 0.5, %v2681_v40 }
 0x803   :  { %v2685_v22 = vadd.f32 %v2684_v7, %v2683_v3 }
 0x805   :  { %3398 = vtanh.f32 %v2685_v22 }
 0x80c   :  { %v2843_v51 = vpop.f32.mrb[28].mxu0 }
 0x80d   :  { %v2844_v9 = vadd.f32 %v2843_v51, %v2722_v39  ;;  %v2845_v10 = vpop.f32.mrb[29].mxu0 }
 0x80e   :  { %v2846_v12 = vadd.f32 %v2845_v10, %v2726_v41  ;;  %v2847_v0 = vpop.f32.mrb[30].mxu0 }
 0x80f   :  { %v3399_v13 = vpop.eup %3398  ;;  %2882 = vst [vmem:[%s4447_s5] sm:$0xff] %v2844_v9  ;;  %v2848_v4 = vadd.f32 %v2847_v0, %v2722_v39  ;;  %v2849_v16 = vpop.f32.mrb[31].mxu0 }
 0x810   :  { %2883 = vst [vmem:[%s4447_s5 + $0x8] sm:$0xff] %v2846_v12  ;;  %v2850_v17 = vadd.f32 %v2849_v16, %v2726_v41  ;;  %v2687_v18 = vmul.f32 %v3399_v13, %v2682_v11 }
 0x811   :  { %2884 = vst [vmem:[%s4447_s5 + $0x10] sm:$0xff] %v2848_v4 }
 0x812   :  { %2885 = vst [vmem:[%s4447_s5 + $0x18] sm:$0xff] %v2850_v17  ;;  %v2700_v20 = vpack.c.bf16 %v2687_v18, %v4315_v38 }
 0x814   :  { %v2853_v33 = vpop.f32.mrb[32].mxu0  ;;  %2872 = vmatmul.mubr.bf16.gmra.mrb[40].mxu0 %v2700_v20 }
 0x815   :  { %v2854_v50 = vadd.f32 %v2853_v33, %v2722_v39  ;;  %v2855_v53 = vpop.f32.mrb[33].mxu0 }
 0x816   :  { %v2856_v28 = vadd.f32 %v2855_v53, %v2726_v41  ;;  %v2857_v29 = vpop.f32.mrb[34].mxu0 }
 0x817   :  { %2886 = vst [vmem:[%s4447_s5 + $0x20] sm:$0xff] %v2854_v50  ;;  %v2858_v31 = vadd.f32 %v2857_v29, %v2722_v39  ;;  %v2859_v32 = vpop.f32.mrb[35].mxu0 }
 0x818   :  { %2887 = vst [vmem:[%s4447_s5 + $0x28] sm:$0xff] %v2856_v28  ;;  %v2860_v34 = vadd.f32 %v2859_v32, %v2726_v41 }
 0x819   :  { %2888 = vst [vmem:[%s4447_s5 + $0x30] sm:$0xff] %v2858_v31 }
 0x81a   :  { %2889 = vst [vmem:[%s4447_s5 + $0x38] sm:$0xff] %v2860_v34 }
 0x81c   :  { %v2863_v38 = vpop.f32.mrb[36].mxu0 }
 0x81d   :  { %v2864_v21 = vadd.f32 %v2863_v38, %v2722_v39  ;;  %v2865_v35 = vpop.f32.mrb[37].mxu0 }
 0x81e   :  { %v2866_v36 = vadd.f32 %v2865_v35, %v2726_v41  ;;  %v2867_v6 = vpop.f32.mrb[38].mxu0 }
 0x81f   :  { %2890 = vst [vmem:[%s4447_s5 + $0x40] sm:$0xff] %v2864_v21  ;;  %v2868_v19 = vadd.f32 %v2867_v6, %v2722_v39  ;;  %v2869_v48 = vpop.f32.mrb[39].mxu0 }
 0x820   :  { %2891 = vst [vmem:[%s4447_s5 + $0x48] sm:$0xff] %v2866_v36  ;;  %v2870_v24 = vadd.f32 %v2869_v48, %v2726_v41 }
 0x821   :  { %2892 = vst [vmem:[%s4447_s5 + $0x50] sm:$0xff] %v2868_v19 }
 0x822   :  { %2893 = vst [vmem:[%s4447_s5 + $0x58] sm:$0xff] %v2870_v24 }
 0x8e7   :  { %v2873_v49 = vpop.f32.mrb[40].mxu0 }
 0x8e8   :  { %v2874_v8 = vadd.f32 %v2873_v49, %v2722_v39  ;;  %v2875_v62 = vpop.f32.mrb[41].mxu0 }
 0x8e9   :  { %v2876_v25 = vadd.f32 %v2875_v62, %v2726_v41  ;;  %v2877_v27 = vpop.f32.mrb[42].mxu0 }
 0x8ea   :  { %2894 = vst [vmem:[%s4447_s5 + $0x60] sm:$0xff] %v2874_v8  ;;  %v2878_v54 = vadd.f32 %v2877_v27, %v2722_v39  ;;  %v2879_v60 = vpop.f32.mrb[43].mxu0 }
 0x8eb   :  { %2895 = vst [vmem:[%s4447_s5 + $0x68] sm:$0xff] %v2876_v25  ;;  %v2880_v15 = vadd.f32 %v2879_v60, %v2726_v41 }
 0x8ec   :  { %2896 = vst [vmem:[%s4447_s5 + $0x70] sm:$0xff] %v2878_v54 }
 0x8ed   :  { %2897 = vst [vmem:[%s4447_s5 + $0x78] sm:$0xff] %v2880_v15 }

</bundles_post_ra>
